<compile_context>
chip_gen: v5e
topology: v5e:2x2
jax: 0.10.0
libtpu: 0.0.40
codegen_flags: <defaults>
</compile_context>

<pallas_src>
import functools

import jax
import jax.numpy as jnp
from jax.experimental import pallas as pl
from jax.experimental.pallas import tpu as pltpu

CFG = dict(vocab=64, max_pos=8, type_vocab=2, H=128, NH=4, I=256, L=2, C=4)
LN_EPS = 1e-12


# ---------------------------------------------------------------------------
# Fused kernel
# ---------------------------------------------------------------------------
def _layernorm(x, g, b):
    mu = jnp.mean(x, axis=-1, keepdims=True)
    xc = x - mu
    var = jnp.mean(xc * xc, axis=-1, keepdims=True)
    return xc * jax.lax.rsqrt(var + LN_EPS) * g + b


def _gelu_tanh(x):
    # tanh-approx GELU.
    # TODO(synk): HF BERT uses exact erf GELU; tanh approximation differs by ~1e-3.
    return 0.5 * x * (1.0 + jnp.tanh(0.7978845608028654 * (x + 0.044715 * x * x * x)))


def _bert_fused_kernel(
    emb_ref, bias_ref,
    emb_ln_g_ref, emb_ln_b_ref,
    wqkv_ref, bqkv_ref, wo_ref, bo_ref,
    ln1_g_ref, ln1_b_ref,
    w1_ref, b1_ref, w2_ref, b2_ref,
    ln2_g_ref, ln2_b_ref,
    wp_ref, bp_ref, wc_ref, bc_ref,
    out_ref,
    *, num_layers, num_heads, head_dim, seq,
):
    H = num_heads * head_dim

    # Additive attention-mask bias, broadcast once (hoisted out of layer/head loops).
    bias = jnp.broadcast_to(bias_ref[0], (seq, seq))                       # (S, S)

    # --- BERT embeddings LayerNorm (no residual)
    x = _layernorm(emb_ref[...], emb_ln_g_ref[...], emb_ln_b_ref[...])     # (S, H)

    for l in range(num_layers):                                            # static unroll
        # Fused Q|K|V projection; 1/sqrt(D) is pre-folded into the Q slice of the weight.
        qkv = jnp.dot(x, wqkv_ref[l], preferred_element_type=jnp.float32) + bqkv_ref[l]

        # Per-head attention; context re-assembled lane-dense as (S, H).
        ctx_heads = []
        for h in range(num_heads):                                         # static unroll
            q = qkv[:, h * head_dim:(h + 1) * head_dim]
            k = qkv[:, H + h * head_dim:H + (h + 1) * head_dim]
            v = qkv[:, 2 * H + h * head_dim:2 * H + (h + 1) * head_dim]
            s = jax.lax.dot_general(q, k, (((1,), (1,)), ((), ())),
                                    preferred_element_type=jnp.float32) + bias
            s = s - jnp.max(s, axis=-1, keepdims=True)                     # stable softmax
            p = jnp.exp(s)
            p = p * pl.reciprocal(jnp.sum(p, axis=-1, keepdims=True), approx=True)
            ctx_heads.append(jnp.dot(p, v, preferred_element_type=jnp.float32))
        ctx = jnp.concatenate(ctx_heads, axis=-1)                          # (S, H)

        # Attention output projection + residual + LayerNorm (fused epilogue)
        attn_out = jnp.dot(ctx, wo_ref[l], preferred_element_type=jnp.float32) + bo_ref[l]
        x = _layernorm(attn_out + x, ln1_g_ref[l], ln1_b_ref[l])

        # FFN with GELU + residual + LayerNorm (fused epilogue)
        hmid = _gelu_tanh(jnp.dot(x, w1_ref[l], preferred_element_type=jnp.float32) + b1_ref[l])
        ffn = jnp.dot(hmid, w2_ref[l], preferred_element_type=jnp.float32) + b2_ref[l]
        x = _layernorm(ffn + x, ln2_g_ref[l], ln2_b_ref[l])

    # --- Pooler on [CLS] (row 0 of this batch) -> tanh
    cls = x[0:1, :]
    pooled = jnp.tanh(jnp.dot(cls, wp_ref[...], preferred_element_type=jnp.float32) + bp_ref[...])

    # Dropout(0.3) is identity at inference.
    # TODO(synk): training-mode stochastic dropout not implemented (inference semantics).
    logits = jnp.dot(pooled, wc_ref[...], preferred_element_type=jnp.float32) + bc_ref[...]  # (1, 128)

    # Lane-dense store (classifier padded to 128 lanes; rows are replicas of row 0).
    out_ref[0] = jnp.broadcast_to(logits, (seq, 128))


# ---------------------------------------------------------------------------
# Parameters (deterministic synthetic init — no checkpoint loading)
# ---------------------------------------------------------------------------
def init_params(key):
    H, NH, I, L, C = CFG["H"], CFG["NH"], CFG["I"], CFG["L"], CFG["C"]

    def nrm(k, shape, scale=0.02):
        return scale * jax.random.normal(k, shape, jnp.float32)

    keys = iter(jax.random.split(key, 256))
    p = {
        "word_emb": nrm(next(keys), (CFG["vocab"], H)),
        "pos_emb": nrm(next(keys), (CFG["max_pos"], H)),
        "type_emb": nrm(next(keys), (CFG["type_vocab"], H)),
        "emb_ln_g": jnp.ones((H,), jnp.float32),
        "emb_ln_b": jnp.zeros((H,), jnp.float32),
        "layers": [],
        "wp": nrm(next(keys), (H, H)), "bp": jnp.zeros((H,), jnp.float32),
        "wc": nrm(next(keys), (H, C)), "bc": jnp.zeros((C,), jnp.float32),
    }
    for _ in range(L):
        lyr = {
            "wq": nrm(next(keys), (H, H)), "bq": jnp.zeros((H,), jnp.float32),
            "wk": nrm(next(keys), (H, H)), "bk": jnp.zeros((H,), jnp.float32),
            "wv": nrm(next(keys), (H, H)), "bv": jnp.zeros((H,), jnp.float32),
            "wo": nrm(next(keys), (H, H)), "bo": jnp.zeros((H,), jnp.float32),
            "ln1_g": jnp.ones((H,), jnp.float32), "ln1_b": jnp.zeros((H,), jnp.float32),
            "w1": nrm(next(keys), (H, I)), "b1": jnp.zeros((I,), jnp.float32),
            "w2": nrm(next(keys), (I, H)), "b2": jnp.zeros((H,), jnp.float32),
            "ln2_g": jnp.ones((H,), jnp.float32), "ln2_b": jnp.zeros((H,), jnp.float32),
        }
        p["layers"].append(lyr)
    return p


def pack_params(p):
    """Stack per-layer weights, fuse QKV, fold the attention scale, pad classifier.

    Called ONCE (outside the jitted forward) so no packing ops run per call.
    """
    H, NH, I, C = CFG["H"], CFG["NH"], CFG["I"], CFG["C"]
    D = H // NH
    scale = float(D) ** -0.5
    lyrs = p["layers"]

    def stk(fn):
        return jnp.stack([fn(l) for l in lyrs])

    packed = dict(
        word_emb=p["word_emb"],
        pos_emb=p["pos_emb"],
        type_emb=p["type_emb"],
        emb_ln_g=p["emb_ln_g"].reshape(1, H),
        emb_ln_b=p["emb_ln_b"].reshape(1, H),
        wqkv=stk(lambda l: jnp.concatenate([l["wq"] * scale, l["wk"], l["wv"]], axis=1)),
        bqkv=stk(lambda l: jnp.concatenate([l["bq"] * scale, l["bk"], l["bv"]]).reshape(1, 3 * H)),
        wo=stk(lambda l: l["wo"]),
        bo=stk(lambda l: l["bo"].reshape(1, H)),
        ln1_g=stk(lambda l: l["ln1_g"].reshape(1, H)),
        ln1_b=stk(lambda l: l["ln1_b"].reshape(1, H)),
        w1=stk(lambda l: l["w1"]),
        b1=stk(lambda l: l["b1"].reshape(1, I)),
        w2=stk(lambda l: l["w2"]),
        b2=stk(lambda l: l["b2"].reshape(1, H)),
        ln2_g=stk(lambda l: l["ln2_g"].reshape(1, H)),
        ln2_b=stk(lambda l: l["ln2_b"].reshape(1, H)),
        wp=p["wp"],
        bp=p["bp"].reshape(1, H),
        wc=jnp.zeros((H, 128), jnp.float32).at[:, :C].set(p["wc"]),
        bc=jnp.zeros((1, 128), jnp.float32).at[0, :C].set(p["bc"]),
    )
    return jax.tree_util.tree_map(jnp.asarray, packed)


WEIGHT_ORDER = ["emb_ln_g", "emb_ln_b", "wqkv", "bqkv", "wo", "bo",
                "ln1_g", "ln1_b", "w1", "b1", "w2", "b2", "ln2_g", "ln2_b",
                "wp", "bp", "wc", "bc"]


# ---------------------------------------------------------------------------
# Forward pass (mirrors BERTBaseClassifier.forward) — takes PRE-PACKED weights
# ---------------------------------------------------------------------------
def bert_classifier_forward(w, ids, mask, token_type_ids):
    B, S = ids.shape
    H, NH, L, C = CFG["H"], CFG["NH"], CFG["L"], CFG["C"]
    D = H // NH

    # Embedding gathers stay in JAX (glue); everything else runs in the fused kernel.
    emb = (w["word_emb"][ids]
           + w["pos_emb"][jnp.arange(S)][None, :, :]
           + w["type_emb"][token_type_ids]).reshape(B * S, H)

    # HF-style additive attention-mask bias, (B, 1, S)
    bias3 = ((1.0 - mask.astype(jnp.float32)) * -1e9)[:, None, :]

    weight_args = [w[k] for k in WEIGHT_ORDER]

    def _whole(a):
        nd = a.ndim
        return pl.BlockSpec(a.shape, lambda b, _nd=nd: (0,) * _nd)   # constant block -> DMA'd once

    in_specs = [
        pl.BlockSpec((S, H), lambda b: (b, 0)),          # this batch's embeddings
        pl.BlockSpec((1, 1, S), lambda b: (b, 0, 0)),    # this batch's mask bias
    ] + [_whole(a) for a in weight_args]

    out = pl.pallas_call(
        functools.partial(_bert_fused_kernel,
                          num_layers=L, num_heads=NH, head_dim=D, seq=S),
        out_shape=jax.ShapeDtypeStruct((B, S, 128), jnp.float32),
        grid=(B,),
        in_specs=in_specs,
        out_specs=pl.BlockSpec((1, S, 128), lambda b: (b, 0, 0)),
        compiler_params=pltpu.CompilerParams(
            dimension_semantics=("parallel",)),
    )(emb, bias3, *weight_args)

    # Row 0 of each batch block holds the (128-padded) logits.
    return out[:, 0, :C]


# ---------------------------------------------------------------------------
if __name__ == "__main__":
    key = jax.random.PRNGKey(0)
    params = init_params(key)
    packed = pack_params(params)          # one-time weight packing, off the hot path

    B, S = 2, CFG["max_pos"]
    ids = jax.random.randint(jax.random.fold_in(key, 1), (B, S), 0, CFG["vocab"],
                             dtype=jnp.int32)
    mask = jnp.array([[1, 1, 1, 1, 1, 1, 1, 1],
                      [1, 1, 1, 1, 1, 0, 0, 0]], dtype=jnp.int32)
    token_type_ids = jnp.zeros((B, S), dtype=jnp.int32)

    fwd = jax.jit(bert_classifier_forward)
    logits = fwd(packed, ids, mask, token_type_ids)
    jax.block_until_ready(logits)
    assert logits.shape == (B, CFG["C"])
    print("KERNEL_OK")
</pallas_src>

<mosaic_0001>
module attributes {stable_mosaic.version = 11 : i64} {
  func.func @_bert_fused_kernel(%arg0: i32, %arg1: memref<8x128xf32, #tpu.memory_space<vmem>>, %arg2: memref<1x1x8xf32, #tpu.memory_space<vmem>>, %arg3: memref<1x128xf32, #tpu.memory_space<vmem>>, %arg4: memref<1x128xf32, #tpu.memory_space<vmem>>, %arg5: memref<2x128x384xf32, #tpu.memory_space<vmem>>, %arg6: memref<2x1x384xf32, #tpu.memory_space<vmem>>, %arg7: memref<2x128x128xf32, #tpu.memory_space<vmem>>, %arg8: memref<2x1x128xf32, #tpu.memory_space<vmem>>, %arg9: memref<2x1x128xf32, #tpu.memory_space<vmem>>, %arg10: memref<2x1x128xf32, #tpu.memory_space<vmem>>, %arg11: memref<2x128x256xf32, #tpu.memory_space<vmem>>, %arg12: memref<2x1x256xf32, #tpu.memory_space<vmem>>, %arg13: memref<2x256x128xf32, #tpu.memory_space<vmem>>, %arg14: memref<2x1x128xf32, #tpu.memory_space<vmem>>, %arg15: memref<2x1x128xf32, #tpu.memory_space<vmem>>, %arg16: memref<2x1x128xf32, #tpu.memory_space<vmem>>, %arg17: memref<128x128xf32, #tpu.memory_space<vmem>>, %arg18: memref<1x128xf32, #tpu.memory_space<vmem>>, %arg19: memref<128x128xf32, #tpu.memory_space<vmem>>, %arg20: memref<1x128xf32, #tpu.memory_space<vmem>>, %arg21: memref<1x8x128xf32, #tpu.memory_space<vmem>>) attributes {dimension_semantics = [#tpu.dimension_semantics<parallel>], iteration_bounds = array<i64: 2>, scalar_prefetch = 0 : i64, scratch_operands = 0 : i64, tpu.core_type = #tpu.core_type<tc>, window_params = [{transform_indices = @transform_0, window_bounds = array<i64: 8, 128>}, {transform_indices = @transform_1, window_bounds = array<i64: 1, 1, 8>}, {pipeline_mode = #tpu.pipeline_mode<synchronous>, transform_indices = @transform_2, window_bounds = array<i64: 1, 128>}, {pipeline_mode = #tpu.pipeline_mode<synchronous>, transform_indices = @transform_3, window_bounds = array<i64: 1, 128>}, {pipeline_mode = #tpu.pipeline_mode<synchronous>, transform_indices = @transform_4, window_bounds = array<i64: 2, 128, 384>}, {pipeline_mode = #tpu.pipeline_mode<synchronous>, transform_indices = @transform_5, window_bounds = array<i64: 2, 1, 384>}, {pipeline_mode = #tpu.pipeline_mode<synchronous>, transform_indices = @transform_6, window_bounds = array<i64: 2, 128, 128>}, {pipeline_mode = #tpu.pipeline_mode<synchronous>, transform_indices = @transform_7, window_bounds = array<i64: 2, 1, 128>}, {pipeline_mode = #tpu.pipeline_mode<synchronous>, transform_indices = @transform_8, window_bounds = array<i64: 2, 1, 128>}, {pipeline_mode = #tpu.pipeline_mode<synchronous>, transform_indices = @transform_9, window_bounds = array<i64: 2, 1, 128>}, {pipeline_mode = #tpu.pipeline_mode<synchronous>, transform_indices = @transform_10, window_bounds = array<i64: 2, 128, 256>}, {pipeline_mode = #tpu.pipeline_mode<synchronous>, transform_indices = @transform_11, window_bounds = array<i64: 2, 1, 256>}, {pipeline_mode = #tpu.pipeline_mode<synchronous>, transform_indices = @transform_12, window_bounds = array<i64: 2, 256, 128>}, {pipeline_mode = #tpu.pipeline_mode<synchronous>, transform_indices = @transform_13, window_bounds = array<i64: 2, 1, 128>}, {pipeline_mode = #tpu.pipeline_mode<synchronous>, transform_indices = @transform_14, window_bounds = array<i64: 2, 1, 128>}, {pipeline_mode = #tpu.pipeline_mode<synchronous>, transform_indices = @transform_15, window_bounds = array<i64: 2, 1, 128>}, {pipeline_mode = #tpu.pipeline_mode<synchronous>, transform_indices = @transform_16, window_bounds = array<i64: 128, 128>}, {pipeline_mode = #tpu.pipeline_mode<synchronous>, transform_indices = @transform_17, window_bounds = array<i64: 1, 128>}, {pipeline_mode = #tpu.pipeline_mode<synchronous>, transform_indices = @transform_18, window_bounds = array<i64: 128, 128>}, {pipeline_mode = #tpu.pipeline_mode<synchronous>, transform_indices = @transform_19, window_bounds = array<i64: 1, 128>}, {transform_indices = @transform_20, window_bounds = array<i64: 1, 8, 128>}]} {
    %c0 = arith.constant 0 : index
    %c0_0 = arith.constant 0 : index
    %c0_1 = arith.constant 0 : index
    %0 = vector.load %arg2[%c0, %c0_0, %c0_1] : memref<1x1x8xf32, #tpu.memory_space<vmem>>, vector<1x1x8xf32>
    %1 = vector.shape_cast %0 : vector<1x1x8xf32> to vector<1x8xf32>
    %2 = vector.shape_cast %1 : vector<1x8xf32> to vector<1x8xf32>
    %3 = vector.broadcast %2 : vector<1x8xf32> to vector<8x8xf32>
    %c0_2 = arith.constant 0 : index
    %c0_3 = arith.constant 0 : index
    %4 = vector.load %arg1[%c0_2, %c0_3] : memref<8x128xf32, #tpu.memory_space<vmem>>, vector<8x128xf32>
    %c0_4 = arith.constant 0 : index
    %c0_5 = arith.constant 0 : index
    %5 = vector.load %arg3[%c0_4, %c0_5] : memref<1x128xf32, #tpu.memory_space<vmem>>, vector<1x128xf32>
    %c0_6 = arith.constant 0 : index
    %c0_7 = arith.constant 0 : index
    %6 = vector.load %arg4[%c0_6, %c0_7] : memref<1x128xf32, #tpu.memory_space<vmem>>, vector<1x128xf32>
    %cst = arith.constant dense<0.000000e+00> : vector<8xf32>
    %7 = vector.multi_reduction <add>, %4, %cst [1] : vector<8x128xf32> to vector<8xf32>
    %8 = vector.shape_cast %7 : vector<8xf32> to vector<8x1xf32>
    %cst_8 = arith.constant 1.280000e+02 : f32
    %9 = vector.broadcast %cst_8 : f32 to vector<8x1xf32>
    %10 = arith.divf %8, %9 : vector<8x1xf32>
    %11 = vector.broadcast %10 : vector<8x1xf32> to vector<8x128xf32>
    %12 = arith.subf %4, %11 : vector<8x128xf32>
    %13 = arith.mulf %12, %12 : vector<8x128xf32>
    %cst_9 = arith.constant dense<0.000000e+00> : vector<8xf32>
    %14 = vector.multi_reduction <add>, %13, %cst_9 [1] : vector<8x128xf32> to vector<8xf32>
    %15 = vector.shape_cast %14 : vector<8xf32> to vector<8x1xf32>
    %cst_10 = arith.constant 1.280000e+02 : f32
    %16 = vector.broadcast %cst_10 : f32 to vector<8x1xf32>
    %17 = arith.divf %15, %16 : vector<8x1xf32>
    %cst_11 = arith.constant 9.99999996E-13 : f32
    %18 = vector.broadcast %cst_11 : f32 to vector<8x1xf32>
    %19 = arith.addf %17, %18 : vector<8x1xf32>
    %20 = math.rsqrt %19 : vector<8x1xf32>
    %21 = vector.broadcast %20 : vector<8x1xf32> to vector<8x128xf32>
    %22 = arith.mulf %12, %21 : vector<8x128xf32>
    %23 = vector.broadcast %5 : vector<1x128xf32> to vector<8x128xf32>
    %24 = arith.mulf %22, %23 : vector<8x128xf32>
    %25 = vector.broadcast %6 : vector<1x128xf32> to vector<8x128xf32>
    %26 = arith.addf %24, %25 : vector<8x128xf32>
    %c0_12 = arith.constant 0 : index
    %c0_13 = arith.constant 0 : index
    %c0_14 = arith.constant 0 : index
    %27 = vector.load %arg5[%c0_12, %c0_13, %c0_14] : memref<2x128x384xf32, #tpu.memory_space<vmem>>, vector<1x128x384xf32>
    %28 = vector.shape_cast %27 : vector<1x128x384xf32> to vector<128x384xf32>
    %cst_15 = arith.constant dense<0.000000e+00> : vector<8x384xf32>
    %29 = tpu.matmul %26, %28, %cst_15 {dimension_numbers = #tpu.dot_dimension_numbers<[1], [0], [0], [1], [0, 0, 1, 1], [], []>} : vector<8x128xf32>, vector<128x384xf32>, vector<8x384xf32> -> vector<8x384xf32>
    %c0_16 = arith.constant 0 : index
    %c0_17 = arith.constant 0 : index
    %c0_18 = arith.constant 0 : index
    %30 = vector.load %arg6[%c0_16, %c0_17, %c0_18] : memref<2x1x384xf32, #tpu.memory_space<vmem>>, vector<1x1x384xf32>
    %31 = vector.shape_cast %30 : vector<1x1x384xf32> to vector<1x384xf32>
    %32 = vector.broadcast %31 : vector<1x384xf32> to vector<8x384xf32>
    %33 = arith.addf %29, %32 : vector<8x384xf32>
    %34 = vector.extract_strided_slice %33 {offsets = [0, 0], sizes = [8, 32], strides = [1, 1]} : vector<8x384xf32> to vector<8x32xf32>
    %35 = vector.extract_strided_slice %33 {offsets = [0, 128], sizes = [8, 32], strides = [1, 1]} : vector<8x384xf32> to vector<8x32xf32>
    %36 = vector.extract_strided_slice %33 {offsets = [0, 256], sizes = [8, 32], strides = [1, 1]} : vector<8x384xf32> to vector<8x32xf32>
    %cst_19 = arith.constant dense<0.000000e+00> : vector<8x8xf32>
    %37 = tpu.matmul %34, %35, %cst_19 {dimension_numbers = #tpu.dot_dimension_numbers<[1], [1], [0], [0], [0, 0, 1, 0], [], []>} : vector<8x32xf32>, vector<8x32xf32>, vector<8x8xf32> -> vector<8x8xf32>
    %38 = arith.addf %37, %3 : vector<8x8xf32>
    %cst_20 = arith.constant dense<0xFF800000> : vector<8xf32>
    %39 = vector.multi_reduction <maximumf>, %38, %cst_20 [1] : vector<8x8xf32> to vector<8xf32>
    %40 = vector.shape_cast %39 : vector<8xf32> to vector<8x1xf32>
    %41 = vector.broadcast %40 : vector<8x1xf32> to vector<8x8xf32>
    %42 = arith.subf %38, %41 : vector<8x8xf32>
    %43 = math.exp %42 : vector<8x8xf32>
    %cst_21 = arith.constant dense<0.000000e+00> : vector<8xf32>
    %44 = vector.multi_reduction <add>, %43, %cst_21 [1] : vector<8x8xf32> to vector<8xf32>
    %45 = vector.shape_cast %44 : vector<8xf32> to vector<8x1xf32>
    %46 = tpu.reciprocal %45 {approx = true} : vector<8x1xf32> -> vector<8x1xf32>
    %47 = vector.broadcast %46 : vector<8x1xf32> to vector<8x8xf32>
    %48 = arith.mulf %43, %47 : vector<8x8xf32>
    %cst_22 = arith.constant dense<0.000000e+00> : vector<8x32xf32>
    %49 = tpu.matmul %48, %36, %cst_22 {dimension_numbers = #tpu.dot_dimension_numbers<[1], [0], [0], [1], [0, 0, 1, 1], [], []>} : vector<8x8xf32>, vector<8x32xf32>, vector<8x32xf32> -> vector<8x32xf32>
    %50 = vector.extract_strided_slice %33 {offsets = [0, 32], sizes = [8, 32], strides = [1, 1]} : vector<8x384xf32> to vector<8x32xf32>
    %51 = vector.extract_strided_slice %33 {offsets = [0, 160], sizes = [8, 32], strides = [1, 1]} : vector<8x384xf32> to vector<8x32xf32>
    %52 = vector.extract_strided_slice %33 {offsets = [0, 288], sizes = [8, 32], strides = [1, 1]} : vector<8x384xf32> to vector<8x32xf32>
    %cst_23 = arith.constant dense<0.000000e+00> : vector<8x8xf32>
    %53 = tpu.matmul %50, %51, %cst_23 {dimension_numbers = #tpu.dot_dimension_numbers<[1], [1], [0], [0], [0, 0, 1, 0], [], []>} : vector<8x32xf32>, vector<8x32xf32>, vector<8x8xf32> -> vector<8x8xf32>
    %54 = arith.addf %53, %3 : vector<8x8xf32>
    %cst_24 = arith.constant dense<0xFF800000> : vector<8xf32>
    %55 = vector.multi_reduction <maximumf>, %54, %cst_24 [1] : vector<8x8xf32> to vector<8xf32>
    %56 = vector.shape_cast %55 : vector<8xf32> to vector<8x1xf32>
    %57 = vector.broadcast %56 : vector<8x1xf32> to vector<8x8xf32>
    %58 = arith.subf %54, %57 : vector<8x8xf32>
    %59 = math.exp %58 : vector<8x8xf32>
    %cst_25 = arith.constant dense<0.000000e+00> : vector<8xf32>
    %60 = vector.multi_reduction <add>, %59, %cst_25 [1] : vector<8x8xf32> to vector<8xf32>
    %61 = vector.shape_cast %60 : vector<8xf32> to vector<8x1xf32>
    %62 = tpu.reciprocal %61 {approx = true} : vector<8x1xf32> -> vector<8x1xf32>
    %63 = vector.broadcast %62 : vector<8x1xf32> to vector<8x8xf32>
    %64 = arith.mulf %59, %63 : vector<8x8xf32>
    %cst_26 = arith.constant dense<0.000000e+00> : vector<8x32xf32>
    %65 = tpu.matmul %64, %52, %cst_26 {dimension_numbers = #tpu.dot_dimension_numbers<[1], [0], [0], [1], [0, 0, 1, 1], [], []>} : vector<8x8xf32>, vector<8x32xf32>, vector<8x32xf32> -> vector<8x32xf32>
    %66 = vector.extract_strided_slice %33 {offsets = [0, 64], sizes = [8, 32], strides = [1, 1]} : vector<8x384xf32> to vector<8x32xf32>
    %67 = vector.extract_strided_slice %33 {offsets = [0, 192], sizes = [8, 32], strides = [1, 1]} : vector<8x384xf32> to vector<8x32xf32>
    %68 = vector.extract_strided_slice %33 {offsets = [0, 320], sizes = [8, 32], strides = [1, 1]} : vector<8x384xf32> to vector<8x32xf32>
    %cst_27 = arith.constant dense<0.000000e+00> : vector<8x8xf32>
    %69 = tpu.matmul %66, %67, %cst_27 {dimension_numbers = #tpu.dot_dimension_numbers<[1], [1], [0], [0], [0, 0, 1, 0], [], []>} : vector<8x32xf32>, vector<8x32xf32>, vector<8x8xf32> -> vector<8x8xf32>
    %70 = arith.addf %69, %3 : vector<8x8xf32>
    %cst_28 = arith.constant dense<0xFF800000> : vector<8xf32>
    %71 = vector.multi_reduction <maximumf>, %70, %cst_28 [1] : vector<8x8xf32> to vector<8xf32>
    %72 = vector.shape_cast %71 : vector<8xf32> to vector<8x1xf32>
    %73 = vector.broadcast %72 : vector<8x1xf32> to vector<8x8xf32>
    %74 = arith.subf %70, %73 : vector<8x8xf32>
    %75 = math.exp %74 : vector<8x8xf32>
    %cst_29 = arith.constant dense<0.000000e+00> : vector<8xf32>
    %76 = vector.multi_reduction <add>, %75, %cst_29 [1] : vector<8x8xf32> to vector<8xf32>
    %77 = vector.shape_cast %76 : vector<8xf32> to vector<8x1xf32>
    %78 = tpu.reciprocal %77 {approx = true} : vector<8x1xf32> -> vector<8x1xf32>
    %79 = vector.broadcast %78 : vector<8x1xf32> to vector<8x8xf32>
    %80 = arith.mulf %75, %79 : vector<8x8xf32>
    %cst_30 = arith.constant dense<0.000000e+00> : vector<8x32xf32>
    %81 = tpu.matmul %80, %68, %cst_30 {dimension_numbers = #tpu.dot_dimension_numbers<[1], [0], [0], [1], [0, 0, 1, 1], [], []>} : vector<8x8xf32>, vector<8x32xf32>, vector<8x32xf32> -> vector<8x32xf32>
    %82 = vector.extract_strided_slice %33 {offsets = [0, 96], sizes = [8, 32], strides = [1, 1]} : vector<8x384xf32> to vector<8x32xf32>
    %83 = vector.extract_strided_slice %33 {offsets = [0, 224], sizes = [8, 32], strides = [1, 1]} : vector<8x384xf32> to vector<8x32xf32>
    %84 = vector.extract_strided_slice %33 {offsets = [0, 352], sizes = [8, 32], strides = [1, 1]} : vector<8x384xf32> to vector<8x32xf32>
    %cst_31 = arith.constant dense<0.000000e+00> : vector<8x8xf32>
    %85 = tpu.matmul %82, %83, %cst_31 {dimension_numbers = #tpu.dot_dimension_numbers<[1], [1], [0], [0], [0, 0, 1, 0], [], []>} : vector<8x32xf32>, vector<8x32xf32>, vector<8x8xf32> -> vector<8x8xf32>
    %86 = arith.addf %85, %3 : vector<8x8xf32>
    %cst_32 = arith.constant dense<0xFF800000> : vector<8xf32>
    %87 = vector.multi_reduction <maximumf>, %86, %cst_32 [1] : vector<8x8xf32> to vector<8xf32>
    %88 = vector.shape_cast %87 : vector<8xf32> to vector<8x1xf32>
    %89 = vector.broadcast %88 : vector<8x1xf32> to vector<8x8xf32>
    %90 = arith.subf %86, %89 : vector<8x8xf32>
    %91 = math.exp %90 : vector<8x8xf32>
    %cst_33 = arith.constant dense<0.000000e+00> : vector<8xf32>
    %92 = vector.multi_reduction <add>, %91, %cst_33 [1] : vector<8x8xf32> to vector<8xf32>
    %93 = vector.shape_cast %92 : vector<8xf32> to vector<8x1xf32>
    %94 = tpu.reciprocal %93 {approx = true} : vector<8x1xf32> -> vector<8x1xf32>
    %95 = vector.broadcast %94 : vector<8x1xf32> to vector<8x8xf32>
    %96 = arith.mulf %91, %95 : vector<8x8xf32>
    %cst_34 = arith.constant dense<0.000000e+00> : vector<8x32xf32>
    %97 = tpu.matmul %96, %84, %cst_34 {dimension_numbers = #tpu.dot_dimension_numbers<[1], [0], [0], [1], [0, 0, 1, 1], [], []>} : vector<8x8xf32>, vector<8x32xf32>, vector<8x32xf32> -> vector<8x32xf32>
    %98 = tpu.concatenate %49, %65, %81, %97 in 1 : vector<8x32xf32>, vector<8x32xf32>, vector<8x32xf32>, vector<8x32xf32> -> vector<8x128xf32>
    %c0_35 = arith.constant 0 : index
    %c0_36 = arith.constant 0 : index
    %c0_37 = arith.constant 0 : index
    %99 = vector.load %arg7[%c0_35, %c0_36, %c0_37] : memref<2x128x128xf32, #tpu.memory_space<vmem>>, vector<1x128x128xf32>
    %100 = vector.shape_cast %99 : vector<1x128x128xf32> to vector<128x128xf32>
    %cst_38 = arith.constant dense<0.000000e+00> : vector<8x128xf32>
    %101 = tpu.matmul %98, %100, %cst_38 {dimension_numbers = #tpu.dot_dimension_numbers<[1], [0], [0], [1], [0, 0, 1, 1], [], []>} : vector<8x128xf32>, vector<128x128xf32>, vector<8x128xf32> -> vector<8x128xf32>
    %c0_39 = arith.constant 0 : index
    %c0_40 = arith.constant 0 : index
    %c0_41 = arith.constant 0 : index
    %102 = vector.load %arg8[%c0_39, %c0_40, %c0_41] : memref<2x1x128xf32, #tpu.memory_space<vmem>>, vector<1x1x128xf32>
    %103 = vector.shape_cast %102 : vector<1x1x128xf32> to vector<1x128xf32>
    %104 = vector.broadcast %103 : vector<1x128xf32> to vector<8x128xf32>
    %105 = arith.addf %101, %104 : vector<8x128xf32>
    %106 = arith.addf %105, %26 : vector<8x128xf32>
    %c0_42 = arith.constant 0 : index
    %c0_43 = arith.constant 0 : index
    %c0_44 = arith.constant 0 : index
    %107 = vector.load %arg9[%c0_42, %c0_43, %c0_44] : memref<2x1x128xf32, #tpu.memory_space<vmem>>, vector<1x1x128xf32>
    %108 = vector.shape_cast %107 : vector<1x1x128xf32> to vector<1x128xf32>
    %c0_45 = arith.constant 0 : index
    %c0_46 = arith.constant 0 : index
    %c0_47 = arith.constant 0 : index
    %109 = vector.load %arg10[%c0_45, %c0_46, %c0_47] : memref<2x1x128xf32, #tpu.memory_space<vmem>>, vector<1x1x128xf32>
    %110 = vector.shape_cast %109 : vector<1x1x128xf32> to vector<1x128xf32>
    %cst_48 = arith.constant dense<0.000000e+00> : vector<8xf32>
    %111 = vector.multi_reduction <add>, %106, %cst_48 [1] : vector<8x128xf32> to vector<8xf32>
    %112 = vector.shape_cast %111 : vector<8xf32> to vector<8x1xf32>
    %cst_49 = arith.constant 1.280000e+02 : f32
    %113 = vector.broadcast %cst_49 : f32 to vector<8x1xf32>
    %114 = arith.divf %112, %113 : vector<8x1xf32>
    %115 = vector.broadcast %114 : vector<8x1xf32> to vector<8x128xf32>
    %116 = arith.subf %106, %115 : vector<8x128xf32>
    %117 = arith.mulf %116, %116 : vector<8x128xf32>
    %cst_50 = arith.constant dense<0.000000e+00> : vector<8xf32>
    %118 = vector.multi_reduction <add>, %117, %cst_50 [1] : vector<8x128xf32> to vector<8xf32>
    %119 = vector.shape_cast %118 : vector<8xf32> to vector<8x1xf32>
    %cst_51 = arith.constant 1.280000e+02 : f32
    %120 = vector.broadcast %cst_51 : f32 to vector<8x1xf32>
    %121 = arith.divf %119, %120 : vector<8x1xf32>
    %cst_52 = arith.constant 9.99999996E-13 : f32
    %122 = vector.broadcast %cst_52 : f32 to vector<8x1xf32>
    %123 = arith.addf %121, %122 : vector<8x1xf32>
    %124 = math.rsqrt %123 : vector<8x1xf32>
    %125 = vector.broadcast %124 : vector<8x1xf32> to vector<8x128xf32>
    %126 = arith.mulf %116, %125 : vector<8x128xf32>
    %127 = vector.broadcast %108 : vector<1x128xf32> to vector<8x128xf32>
    %128 = arith.mulf %126, %127 : vector<8x128xf32>
    %129 = vector.broadcast %110 : vector<1x128xf32> to vector<8x128xf32>
    %130 = arith.addf %128, %129 : vector<8x128xf32>
    %c0_53 = arith.constant 0 : index
    %c0_54 = arith.constant 0 : index
    %c0_55 = arith.constant 0 : index
    %131 = vector.load %arg11[%c0_53, %c0_54, %c0_55] : memref<2x128x256xf32, #tpu.memory_space<vmem>>, vector<1x128x256xf32>
    %132 = vector.shape_cast %131 : vector<1x128x256xf32> to vector<128x256xf32>
    %cst_56 = arith.constant dense<0.000000e+00> : vector<8x256xf32>
    %133 = tpu.matmul %130, %132, %cst_56 {dimension_numbers = #tpu.dot_dimension_numbers<[1], [0], [0], [1], [0, 0, 1, 1], [], []>} : vector<8x128xf32>, vector<128x256xf32>, vector<8x256xf32> -> vector<8x256xf32>
    %c0_57 = arith.constant 0 : index
    %c0_58 = arith.constant 0 : index
    %c0_59 = arith.constant 0 : index
    %134 = vector.load %arg12[%c0_57, %c0_58, %c0_59] : memref<2x1x256xf32, #tpu.memory_space<vmem>>, vector<1x1x256xf32>
    %135 = vector.shape_cast %134 : vector<1x1x256xf32> to vector<1x256xf32>
    %136 = vector.broadcast %135 : vector<1x256xf32> to vector<8x256xf32>
    %137 = arith.addf %133, %136 : vector<8x256xf32>
    %cst_60 = arith.constant 5.000000e-01 : f32
    %138 = vector.broadcast %cst_60 : f32 to vector<8x256xf32>
    %139 = arith.mulf %138, %137 : vector<8x256xf32>
    %cst_61 = arith.constant 4.471500e-02 : f32
    %140 = vector.broadcast %cst_61 : f32 to vector<8x256xf32>
    %141 = arith.mulf %140, %137 : vector<8x256xf32>
    %142 = arith.mulf %141, %137 : vector<8x256xf32>
    %143 = arith.mulf %142, %137 : vector<8x256xf32>
    %144 = arith.addf %137, %143 : vector<8x256xf32>
    %cst_62 = arith.constant 0.797884583 : f32
    %145 = vector.broadcast %cst_62 : f32 to vector<8x256xf32>
    %146 = arith.mulf %145, %144 : vector<8x256xf32>
    %147 = math.tanh %146 : vector<8x256xf32>
    %cst_63 = arith.constant 1.000000e+00 : f32
    %148 = vector.broadcast %cst_63 : f32 to vector<8x256xf32>
    %149 = arith.addf %148, %147 : vector<8x256xf32>
    %150 = arith.mulf %139, %149 : vector<8x256xf32>
    %c0_64 = arith.constant 0 : index
    %c0_65 = arith.constant 0 : index
    %c0_66 = arith.constant 0 : index
    %151 = vector.load %arg13[%c0_64, %c0_65, %c0_66] : memref<2x256x128xf32, #tpu.memory_space<vmem>>, vector<1x256x128xf32>
    %152 = vector.shape_cast %151 : vector<1x256x128xf32> to vector<256x128xf32>
    %cst_67 = arith.constant dense<0.000000e+00> : vector<8x128xf32>
    %153 = tpu.matmul %150, %152, %cst_67 {dimension_numbers = #tpu.dot_dimension_numbers<[1], [0], [0], [1], [0, 0, 1, 1], [], []>} : vector<8x256xf32>, vector<256x128xf32>, vector<8x128xf32> -> vector<8x128xf32>
    %c0_68 = arith.constant 0 : index
    %c0_69 = arith.constant 0 : index
    %c0_70 = arith.constant 0 : index
    %154 = vector.load %arg14[%c0_68, %c0_69, %c0_70] : memref<2x1x128xf32, #tpu.memory_space<vmem>>, vector<1x1x128xf32>
    %155 = vector.shape_cast %154 : vector<1x1x128xf32> to vector<1x128xf32>
    %156 = vector.broadcast %155 : vector<1x128xf32> to vector<8x128xf32>
    %157 = arith.addf %153, %156 : vector<8x128xf32>
    %158 = arith.addf %157, %130 : vector<8x128xf32>
    %c0_71 = arith.constant 0 : index
    %c0_72 = arith.constant 0 : index
    %c0_73 = arith.constant 0 : index
    %159 = vector.load %arg15[%c0_71, %c0_72, %c0_73] : memref<2x1x128xf32, #tpu.memory_space<vmem>>, vector<1x1x128xf32>
    %160 = vector.shape_cast %159 : vector<1x1x128xf32> to vector<1x128xf32>
    %c0_74 = arith.constant 0 : index
    %c0_75 = arith.constant 0 : index
    %c0_76 = arith.constant 0 : index
    %161 = vector.load %arg16[%c0_74, %c0_75, %c0_76] : memref<2x1x128xf32, #tpu.memory_space<vmem>>, vector<1x1x128xf32>
    %162 = vector.shape_cast %161 : vector<1x1x128xf32> to vector<1x128xf32>
    %cst_77 = arith.constant dense<0.000000e+00> : vector<8xf32>
    %163 = vector.multi_reduction <add>, %158, %cst_77 [1] : vector<8x128xf32> to vector<8xf32>
    %164 = vector.shape_cast %163 : vector<8xf32> to vector<8x1xf32>
    %cst_78 = arith.constant 1.280000e+02 : f32
    %165 = vector.broadcast %cst_78 : f32 to vector<8x1xf32>
    %166 = arith.divf %164, %165 : vector<8x1xf32>
    %167 = vector.broadcast %166 : vector<8x1xf32> to vector<8x128xf32>
    %168 = arith.subf %158, %167 : vector<8x128xf32>
    %169 = arith.mulf %168, %168 : vector<8x128xf32>
    %cst_79 = arith.constant dense<0.000000e+00> : vector<8xf32>
    %170 = vector.multi_reduction <add>, %169, %cst_79 [1] : vector<8x128xf32> to vector<8xf32>
    %171 = vector.shape_cast %170 : vector<8xf32> to vector<8x1xf32>
    %cst_80 = arith.constant 1.280000e+02 : f32
    %172 = vector.broadcast %cst_80 : f32 to vector<8x1xf32>
    %173 = arith.divf %171, %172 : vector<8x1xf32>
    %cst_81 = arith.constant 9.99999996E-13 : f32
    %174 = vector.broadcast %cst_81 : f32 to vector<8x1xf32>
    %175 = arith.addf %173, %174 : vector<8x1xf32>
    %176 = math.rsqrt %175 : vector<8x1xf32>
    %177 = vector.broadcast %176 : vector<8x1xf32> to vector<8x128xf32>
    %178 = arith.mulf %168, %177 : vector<8x128xf32>
    %179 = vector.broadcast %160 : vector<1x128xf32> to vector<8x128xf32>
    %180 = arith.mulf %178, %179 : vector<8x128xf32>
    %181 = vector.broadcast %162 : vector<1x128xf32> to vector<8x128xf32>
    %182 = arith.addf %180, %181 : vector<8x128xf32>
    %c1 = arith.constant 1 : index
    %c0_82 = arith.constant 0 : index
    %c0_83 = arith.constant 0 : index
    %183 = vector.load %arg5[%c1, %c0_82, %c0_83] : memref<2x128x384xf32, #tpu.memory_space<vmem>>, vector<1x128x384xf32>
    %184 = vector.shape_cast %183 : vector<1x128x384xf32> to vector<128x384xf32>
    %cst_84 = arith.constant dense<0.000000e+00> : vector<8x384xf32>
    %185 = tpu.matmul %182, %184, %cst_84 {dimension_numbers = #tpu.dot_dimension_numbers<[1], [0], [0], [1], [0, 0, 1, 1], [], []>} : vector<8x128xf32>, vector<128x384xf32>, vector<8x384xf32> -> vector<8x384xf32>
    %c1_85 = arith.constant 1 : index
    %c0_86 = arith.constant 0 : index
    %c0_87 = arith.constant 0 : index
    %186 = vector.load %arg6[%c1_85, %c0_86, %c0_87] : memref<2x1x384xf32, #tpu.memory_space<vmem>>, vector<1x1x384xf32>
    %187 = vector.shape_cast %186 : vector<1x1x384xf32> to vector<1x384xf32>
    %188 = vector.broadcast %187 : vector<1x384xf32> to vector<8x384xf32>
    %189 = arith.addf %185, %188 : vector<8x384xf32>
    %190 = vector.extract_strided_slice %189 {offsets = [0, 0], sizes = [8, 32], strides = [1, 1]} : vector<8x384xf32> to vector<8x32xf32>
    %191 = vector.extract_strided_slice %189 {offsets = [0, 128], sizes = [8, 32], strides = [1, 1]} : vector<8x384xf32> to vector<8x32xf32>
    %192 = vector.extract_strided_slice %189 {offsets = [0, 256], sizes = [8, 32], strides = [1, 1]} : vector<8x384xf32> to vector<8x32xf32>
    %cst_88 = arith.constant dense<0.000000e+00> : vector<8x8xf32>
    %193 = tpu.matmul %190, %191, %cst_88 {dimension_numbers = #tpu.dot_dimension_numbers<[1], [1], [0], [0], [0, 0, 1, 0], [], []>} : vector<8x32xf32>, vector<8x32xf32>, vector<8x8xf32> -> vector<8x8xf32>
    %194 = arith.addf %193, %3 : vector<8x8xf32>
    %cst_89 = arith.constant dense<0xFF800000> : vector<8xf32>
    %195 = vector.multi_reduction <maximumf>, %194, %cst_89 [1] : vector<8x8xf32> to vector<8xf32>
    %196 = vector.shape_cast %195 : vector<8xf32> to vector<8x1xf32>
    %197 = vector.broadcast %196 : vector<8x1xf32> to vector<8x8xf32>
    %198 = arith.subf %194, %197 : vector<8x8xf32>
    %199 = math.exp %198 : vector<8x8xf32>
    %cst_90 = arith.constant dense<0.000000e+00> : vector<8xf32>
    %200 = vector.multi_reduction <add>, %199, %cst_90 [1] : vector<8x8xf32> to vector<8xf32>
    %201 = vector.shape_cast %200 : vector<8xf32> to vector<8x1xf32>
    %202 = tpu.reciprocal %201 {approx = true} : vector<8x1xf32> -> vector<8x1xf32>
    %203 = vector.broadcast %202 : vector<8x1xf32> to vector<8x8xf32>
    %204 = arith.mulf %199, %203 : vector<8x8xf32>
    %cst_91 = arith.constant dense<0.000000e+00> : vector<8x32xf32>
    %205 = tpu.matmul %204, %192, %cst_91 {dimension_numbers = #tpu.dot_dimension_numbers<[1], [0], [0], [1], [0, 0, 1, 1], [], []>} : vector<8x8xf32>, vector<8x32xf32>, vector<8x32xf32> -> vector<8x32xf32>
    %206 = vector.extract_strided_slice %189 {offsets = [0, 32], sizes = [8, 32], strides = [1, 1]} : vector<8x384xf32> to vector<8x32xf32>
    %207 = vector.extract_strided_slice %189 {offsets = [0, 160], sizes = [8, 32], strides = [1, 1]} : vector<8x384xf32> to vector<8x32xf32>
    %208 = vector.extract_strided_slice %189 {offsets = [0, 288], sizes = [8, 32], strides = [1, 1]} : vector<8x384xf32> to vector<8x32xf32>
    %cst_92 = arith.constant dense<0.000000e+00> : vector<8x8xf32>
    %209 = tpu.matmul %206, %207, %cst_92 {dimension_numbers = #tpu.dot_dimension_numbers<[1], [1], [0], [0], [0, 0, 1, 0], [], []>} : vector<8x32xf32>, vector<8x32xf32>, vector<8x8xf32> -> vector<8x8xf32>
    %210 = arith.addf %209, %3 : vector<8x8xf32>
    %cst_93 = arith.constant dense<0xFF800000> : vector<8xf32>
    %211 = vector.multi_reduction <maximumf>, %210, %cst_93 [1] : vector<8x8xf32> to vector<8xf32>
    %212 = vector.shape_cast %211 : vector<8xf32> to vector<8x1xf32>
    %213 = vector.broadcast %212 : vector<8x1xf32> to vector<8x8xf32>
    %214 = arith.subf %210, %213 : vector<8x8xf32>
    %215 = math.exp %214 : vector<8x8xf32>
    %cst_94 = arith.constant dense<0.000000e+00> : vector<8xf32>
    %216 = vector.multi_reduction <add>, %215, %cst_94 [1] : vector<8x8xf32> to vector<8xf32>
    %217 = vector.shape_cast %216 : vector<8xf32> to vector<8x1xf32>
    %218 = tpu.reciprocal %217 {approx = true} : vector<8x1xf32> -> vector<8x1xf32>
    %219 = vector.broadcast %218 : vector<8x1xf32> to vector<8x8xf32>
    %220 = arith.mulf %215, %219 : vector<8x8xf32>
    %cst_95 = arith.constant dense<0.000000e+00> : vector<8x32xf32>
    %221 = tpu.matmul %220, %208, %cst_95 {dimension_numbers = #tpu.dot_dimension_numbers<[1], [0], [0], [1], [0, 0, 1, 1], [], []>} : vector<8x8xf32>, vector<8x32xf32>, vector<8x32xf32> -> vector<8x32xf32>
    %222 = vector.extract_strided_slice %189 {offsets = [0, 64], sizes = [8, 32], strides = [1, 1]} : vector<8x384xf32> to vector<8x32xf32>
    %223 = vector.extract_strided_slice %189 {offsets = [0, 192], sizes = [8, 32], strides = [1, 1]} : vector<8x384xf32> to vector<8x32xf32>
    %224 = vector.extract_strided_slice %189 {offsets = [0, 320], sizes = [8, 32], strides = [1, 1]} : vector<8x384xf32> to vector<8x32xf32>
    %cst_96 = arith.constant dense<0.000000e+00> : vector<8x8xf32>
    %225 = tpu.matmul %222, %223, %cst_96 {dimension_numbers = #tpu.dot_dimension_numbers<[1], [1], [0], [0], [0, 0, 1, 0], [], []>} : vector<8x32xf32>, vector<8x32xf32>, vector<8x8xf32> -> vector<8x8xf32>
    %226 = arith.addf %225, %3 : vector<8x8xf32>
    %cst_97 = arith.constant dense<0xFF800000> : vector<8xf32>
    %227 = vector.multi_reduction <maximumf>, %226, %cst_97 [1] : vector<8x8xf32> to vector<8xf32>
    %228 = vector.shape_cast %227 : vector<8xf32> to vector<8x1xf32>
    %229 = vector.broadcast %228 : vector<8x1xf32> to vector<8x8xf32>
    %230 = arith.subf %226, %229 : vector<8x8xf32>
    %231 = math.exp %230 : vector<8x8xf32>
    %cst_98 = arith.constant dense<0.000000e+00> : vector<8xf32>
    %232 = vector.multi_reduction <add>, %231, %cst_98 [1] : vector<8x8xf32> to vector<8xf32>
    %233 = vector.shape_cast %232 : vector<8xf32> to vector<8x1xf32>
    %234 = tpu.reciprocal %233 {approx = true} : vector<8x1xf32> -> vector<8x1xf32>
    %235 = vector.broadcast %234 : vector<8x1xf32> to vector<8x8xf32>
    %236 = arith.mulf %231, %235 : vector<8x8xf32>
    %cst_99 = arith.constant dense<0.000000e+00> : vector<8x32xf32>
    %237 = tpu.matmul %236, %224, %cst_99 {dimension_numbers = #tpu.dot_dimension_numbers<[1], [0], [0], [1], [0, 0, 1, 1], [], []>} : vector<8x8xf32>, vector<8x32xf32>, vector<8x32xf32> -> vector<8x32xf32>
    %238 = vector.extract_strided_slice %189 {offsets = [0, 96], sizes = [8, 32], strides = [1, 1]} : vector<8x384xf32> to vector<8x32xf32>
    %239 = vector.extract_strided_slice %189 {offsets = [0, 224], sizes = [8, 32], strides = [1, 1]} : vector<8x384xf32> to vector<8x32xf32>
    %240 = vector.extract_strided_slice %189 {offsets = [0, 352], sizes = [8, 32], strides = [1, 1]} : vector<8x384xf32> to vector<8x32xf32>
    %cst_100 = arith.constant dense<0.000000e+00> : vector<8x8xf32>
    %241 = tpu.matmul %238, %239, %cst_100 {dimension_numbers = #tpu.dot_dimension_numbers<[1], [1], [0], [0], [0, 0, 1, 0], [], []>} : vector<8x32xf32>, vector<8x32xf32>, vector<8x8xf32> -> vector<8x8xf32>
    %242 = arith.addf %241, %3 : vector<8x8xf32>
    %cst_101 = arith.constant dense<0xFF800000> : vector<8xf32>
    %243 = vector.multi_reduction <maximumf>, %242, %cst_101 [1] : vector<8x8xf32> to vector<8xf32>
    %244 = vector.shape_cast %243 : vector<8xf32> to vector<8x1xf32>
    %245 = vector.broadcast %244 : vector<8x1xf32> to vector<8x8xf32>
    %246 = arith.subf %242, %245 : vector<8x8xf32>
    %247 = math.exp %246 : vector<8x8xf32>
    %cst_102 = arith.constant dense<0.000000e+00> : vector<8xf32>
    %248 = vector.multi_reduction <add>, %247, %cst_102 [1] : vector<8x8xf32> to vector<8xf32>
    %249 = vector.shape_cast %248 : vector<8xf32> to vector<8x1xf32>
    %250 = tpu.reciprocal %249 {approx = true} : vector<8x1xf32> -> vector<8x1xf32>
    %251 = vector.broadcast %250 : vector<8x1xf32> to vector<8x8xf32>
    %252 = arith.mulf %247, %251 : vector<8x8xf32>
    %cst_103 = arith.constant dense<0.000000e+00> : vector<8x32xf32>
    %253 = tpu.matmul %252, %240, %cst_103 {dimension_numbers = #tpu.dot_dimension_numbers<[1], [0], [0], [1], [0, 0, 1, 1], [], []>} : vector<8x8xf32>, vector<8x32xf32>, vector<8x32xf32> -> vector<8x32xf32>
    %254 = tpu.concatenate %205, %221, %237, %253 in 1 : vector<8x32xf32>, vector<8x32xf32>, vector<8x32xf32>, vector<8x32xf32> -> vector<8x128xf32>
    %c1_104 = arith.constant 1 : index
    %c0_105 = arith.constant 0 : index
    %c0_106 = arith.constant 0 : index
    %255 = vector.load %arg7[%c1_104, %c0_105, %c0_106] : memref<2x128x128xf32, #tpu.memory_space<vmem>>, vector<1x128x128xf32>
    %256 = vector.shape_cast %255 : vector<1x128x128xf32> to vector<128x128xf32>
    %cst_107 = arith.constant dense<0.000000e+00> : vector<8x128xf32>
    %257 = tpu.matmul %254, %256, %cst_107 {dimension_numbers = #tpu.dot_dimension_numbers<[1], [0], [0], [1], [0, 0, 1, 1], [], []>} : vector<8x128xf32>, vector<128x128xf32>, vector<8x128xf32> -> vector<8x128xf32>
    %c1_108 = arith.constant 1 : index
    %c0_109 = arith.constant 0 : index
    %c0_110 = arith.constant 0 : index
    %258 = vector.load %arg8[%c1_108, %c0_109, %c0_110] : memref<2x1x128xf32, #tpu.memory_space<vmem>>, vector<1x1x128xf32>
    %259 = vector.shape_cast %258 : vector<1x1x128xf32> to vector<1x128xf32>
    %260 = vector.broadcast %259 : vector<1x128xf32> to vector<8x128xf32>
    %261 = arith.addf %257, %260 : vector<8x128xf32>
    %262 = arith.addf %261, %182 : vector<8x128xf32>
    %c1_111 = arith.constant 1 : index
    %c0_112 = arith.constant 0 : index
    %c0_113 = arith.constant 0 : index
    %263 = vector.load %arg9[%c1_111, %c0_112, %c0_113] : memref<2x1x128xf32, #tpu.memory_space<vmem>>, vector<1x1x128xf32>
    %264 = vector.shape_cast %263 : vector<1x1x128xf32> to vector<1x128xf32>
    %c1_114 = arith.constant 1 : index
    %c0_115 = arith.constant 0 : index
    %c0_116 = arith.constant 0 : index
    %265 = vector.load %arg10[%c1_114, %c0_115, %c0_116] : memref<2x1x128xf32, #tpu.memory_space<vmem>>, vector<1x1x128xf32>
    %266 = vector.shape_cast %265 : vector<1x1x128xf32> to vector<1x128xf32>
    %cst_117 = arith.constant dense<0.000000e+00> : vector<8xf32>
    %267 = vector.multi_reduction <add>, %262, %cst_117 [1] : vector<8x128xf32> to vector<8xf32>
    %268 = vector.shape_cast %267 : vector<8xf32> to vector<8x1xf32>
    %cst_118 = arith.constant 1.280000e+02 : f32
    %269 = vector.broadcast %cst_118 : f32 to vector<8x1xf32>
    %270 = arith.divf %268, %269 : vector<8x1xf32>
    %271 = vector.broadcast %270 : vector<8x1xf32> to vector<8x128xf32>
    %272 = arith.subf %262, %271 : vector<8x128xf32>
    %273 = arith.mulf %272, %272 : vector<8x128xf32>
    %cst_119 = arith.constant dense<0.000000e+00> : vector<8xf32>
    %274 = vector.multi_reduction <add>, %273, %cst_119 [1] : vector<8x128xf32> to vector<8xf32>
    %275 = vector.shape_cast %274 : vector<8xf32> to vector<8x1xf32>
    %cst_120 = arith.constant 1.280000e+02 : f32
    %276 = vector.broadcast %cst_120 : f32 to vector<8x1xf32>
    %277 = arith.divf %275, %276 : vector<8x1xf32>
    %cst_121 = arith.constant 9.99999996E-13 : f32
    %278 = vector.broadcast %cst_121 : f32 to vector<8x1xf32>
    %279 = arith.addf %277, %278 : vector<8x1xf32>
    %280 = math.rsqrt %279 : vector<8x1xf32>
    %281 = vector.broadcast %280 : vector<8x1xf32> to vector<8x128xf32>
    %282 = arith.mulf %272, %281 : vector<8x128xf32>
    %283 = vector.broadcast %264 : vector<1x128xf32> to vector<8x128xf32>
    %284 = arith.mulf %282, %283 : vector<8x128xf32>
    %285 = vector.broadcast %266 : vector<1x128xf32> to vector<8x128xf32>
    %286 = arith.addf %284, %285 : vector<8x128xf32>
    %c1_122 = arith.constant 1 : index
    %c0_123 = arith.constant 0 : index
    %c0_124 = arith.constant 0 : index
    %287 = vector.load %arg11[%c1_122, %c0_123, %c0_124] : memref<2x128x256xf32, #tpu.memory_space<vmem>>, vector<1x128x256xf32>
    %288 = vector.shape_cast %287 : vector<1x128x256xf32> to vector<128x256xf32>
    %cst_125 = arith.constant dense<0.000000e+00> : vector<8x256xf32>
    %289 = tpu.matmul %286, %288, %cst_125 {dimension_numbers = #tpu.dot_dimension_numbers<[1], [0], [0], [1], [0, 0, 1, 1], [], []>} : vector<8x128xf32>, vector<128x256xf32>, vector<8x256xf32> -> vector<8x256xf32>
    %c1_126 = arith.constant 1 : index
    %c0_127 = arith.constant 0 : index
    %c0_128 = arith.constant 0 : index
    %290 = vector.load %arg12[%c1_126, %c0_127, %c0_128] : memref<2x1x256xf32, #tpu.memory_space<vmem>>, vector<1x1x256xf32>
    %291 = vector.shape_cast %290 : vector<1x1x256xf32> to vector<1x256xf32>
    %292 = vector.broadcast %291 : vector<1x256xf32> to vector<8x256xf32>
    %293 = arith.addf %289, %292 : vector<8x256xf32>
    %cst_129 = arith.constant 5.000000e-01 : f32
    %294 = vector.broadcast %cst_129 : f32 to vector<8x256xf32>
    %295 = arith.mulf %294, %293 : vector<8x256xf32>
    %cst_130 = arith.constant 4.471500e-02 : f32
    %296 = vector.broadcast %cst_130 : f32 to vector<8x256xf32>
    %297 = arith.mulf %296, %293 : vector<8x256xf32>
    %298 = arith.mulf %297, %293 : vector<8x256xf32>
    %299 = arith.mulf %298, %293 : vector<8x256xf32>
    %300 = arith.addf %293, %299 : vector<8x256xf32>
    %cst_131 = arith.constant 0.797884583 : f32
    %301 = vector.broadcast %cst_131 : f32 to vector<8x256xf32>
    %302 = arith.mulf %301, %300 : vector<8x256xf32>
    %303 = math.tanh %302 : vector<8x256xf32>
    %cst_132 = arith.constant 1.000000e+00 : f32
    %304 = vector.broadcast %cst_132 : f32 to vector<8x256xf32>
    %305 = arith.addf %304, %303 : vector<8x256xf32>
    %306 = arith.mulf %295, %305 : vector<8x256xf32>
    %c1_133 = arith.constant 1 : index
    %c0_134 = arith.constant 0 : index
    %c0_135 = arith.constant 0 : index
    %307 = vector.load %arg13[%c1_133, %c0_134, %c0_135] : memref<2x256x128xf32, #tpu.memory_space<vmem>>, vector<1x256x128xf32>
    %308 = vector.shape_cast %307 : vector<1x256x128xf32> to vector<256x128xf32>
    %cst_136 = arith.constant dense<0.000000e+00> : vector<8x128xf32>
    %309 = tpu.matmul %306, %308, %cst_136 {dimension_numbers = #tpu.dot_dimension_numbers<[1], [0], [0], [1], [0, 0, 1, 1], [], []>} : vector<8x256xf32>, vector<256x128xf32>, vector<8x128xf32> -> vector<8x128xf32>
    %c1_137 = arith.constant 1 : index
    %c0_138 = arith.constant 0 : index
    %c0_139 = arith.constant 0 : index
    %310 = vector.load %arg14[%c1_137, %c0_138, %c0_139] : memref<2x1x128xf32, #tpu.memory_space<vmem>>, vector<1x1x128xf32>
    %311 = vector.shape_cast %310 : vector<1x1x128xf32> to vector<1x128xf32>
    %312 = vector.broadcast %311 : vector<1x128xf32> to vector<8x128xf32>
    %313 = arith.addf %309, %312 : vector<8x128xf32>
    %314 = arith.addf %313, %286 : vector<8x128xf32>
    %c1_140 = arith.constant 1 : index
    %c0_141 = arith.constant 0 : index
    %c0_142 = arith.constant 0 : index
    %315 = vector.load %arg15[%c1_140, %c0_141, %c0_142] : memref<2x1x128xf32, #tpu.memory_space<vmem>>, vector<1x1x128xf32>
    %316 = vector.shape_cast %315 : vector<1x1x128xf32> to vector<1x128xf32>
    %c1_143 = arith.constant 1 : index
    %c0_144 = arith.constant 0 : index
    %c0_145 = arith.constant 0 : index
    %317 = vector.load %arg16[%c1_143, %c0_144, %c0_145] : memref<2x1x128xf32, #tpu.memory_space<vmem>>, vector<1x1x128xf32>
    %318 = vector.shape_cast %317 : vector<1x1x128xf32> to vector<1x128xf32>
    %cst_146 = arith.constant dense<0.000000e+00> : vector<8xf32>
    %319 = vector.multi_reduction <add>, %314, %cst_146 [1] : vector<8x128xf32> to vector<8xf32>
    %320 = vector.shape_cast %319 : vector<8xf32> to vector<8x1xf32>
    %cst_147 = arith.constant 1.280000e+02 : f32
    %321 = vector.broadcast %cst_147 : f32 to vector<8x1xf32>
    %322 = arith.divf %320, %321 : vector<8x1xf32>
    %323 = vector.broadcast %322 : vector<8x1xf32> to vector<8x128xf32>
    %324 = arith.subf %314, %323 : vector<8x128xf32>
    %325 = arith.mulf %324, %324 : vector<8x128xf32>
    %cst_148 = arith.constant dense<0.000000e+00> : vector<8xf32>
    %326 = vector.multi_reduction <add>, %325, %cst_148 [1] : vector<8x128xf32> to vector<8xf32>
    %327 = vector.shape_cast %326 : vector<8xf32> to vector<8x1xf32>
    %cst_149 = arith.constant 1.280000e+02 : f32
    %328 = vector.broadcast %cst_149 : f32 to vector<8x1xf32>
    %329 = arith.divf %327, %328 : vector<8x1xf32>
    %cst_150 = arith.constant 9.99999996E-13 : f32
    %330 = vector.broadcast %cst_150 : f32 to vector<8x1xf32>
    %331 = arith.addf %329, %330 : vector<8x1xf32>
    %332 = math.rsqrt %331 : vector<8x1xf32>
    %333 = vector.broadcast %332 : vector<8x1xf32> to vector<8x128xf32>
    %334 = arith.mulf %324, %333 : vector<8x128xf32>
    %335 = vector.broadcast %316 : vector<1x128xf32> to vector<8x128xf32>
    %336 = arith.mulf %334, %335 : vector<8x128xf32>
    %337 = vector.broadcast %318 : vector<1x128xf32> to vector<8x128xf32>
    %338 = arith.addf %336, %337 : vector<8x128xf32>
    %339 = vector.extract_strided_slice %338 {offsets = [0, 0], sizes = [1, 128], strides = [1, 1]} : vector<8x128xf32> to vector<1x128xf32>
    %c0_151 = arith.constant 0 : index
    %c0_152 = arith.constant 0 : index
    %340 = vector.load %arg17[%c0_151, %c0_152] : memref<128x128xf32, #tpu.memory_space<vmem>>, vector<128x128xf32>
    %cst_153 = arith.constant dense<0.000000e+00> : vector<1x128xf32>
    %341 = tpu.matmul %339, %340, %cst_153 {dimension_numbers = #tpu.dot_dimension_numbers<[1], [0], [0], [1], [0, 0, 1, 1], [], []>} : vector<1x128xf32>, vector<128x128xf32>, vector<1x128xf32> -> vector<1x128xf32>
    %c0_154 = arith.constant 0 : index
    %c0_155 = arith.constant 0 : index
    %342 = vector.load %arg18[%c0_154, %c0_155] : memref<1x128xf32, #tpu.memory_space<vmem>>, vector<1x128xf32>
    %343 = arith.addf %341, %342 : vector<1x128xf32>
    %344 = math.tanh %343 : vector<1x128xf32>
    %c0_156 = arith.constant 0 : index
    %c0_157 = arith.constant 0 : index
    %345 = vector.load %arg19[%c0_156, %c0_157] : memref<128x128xf32, #tpu.memory_space<vmem>>, vector<128x128xf32>
    %cst_158 = arith.constant dense<0.000000e+00> : vector<1x128xf32>
    %346 = tpu.matmul %344, %345, %cst_158 {dimension_numbers = #tpu.dot_dimension_numbers<[1], [0], [0], [1], [0, 0, 1, 1], [], []>} : vector<1x128xf32>, vector<128x128xf32>, vector<1x128xf32> -> vector<1x128xf32>
    %c0_159 = arith.constant 0 : index
    %c0_160 = arith.constant 0 : index
    %347 = vector.load %arg20[%c0_159, %c0_160] : memref<1x128xf32, #tpu.memory_space<vmem>>, vector<1x128xf32>
    %348 = arith.addf %346, %347 : vector<1x128xf32>
    %349 = vector.shape_cast %348 : vector<1x128xf32> to vector<1x128xf32>
    %350 = vector.broadcast %349 : vector<1x128xf32> to vector<8x128xf32>
    %c0_161 = arith.constant 0 : index
    %c0_162 = arith.constant 0 : index
    %c0_163 = arith.constant 0 : index
    %351 = vector.load %arg21[%c0_161, %c0_162, %c0_163] : memref<1x8x128xf32, #tpu.memory_space<vmem>>, vector<1x8x128xf32>
    %352 = vector.shape_cast %351 : vector<1x8x128xf32> to vector<8x128xf32>
    %353 = vector.shape_cast %350 : vector<8x128xf32> to vector<1x8x128xf32>
    tpu.vector_store %arg21[%c0_161, %c0_162, %c0_163], %353 {strides = array<i32>} : memref<1x8x128xf32, #tpu.memory_space<vmem>>, vector<1x8x128xf32>,
    return
  }
  func.func @transform_0(%arg0: i32) -> (i32, i32) {
    %c0_i32 = arith.constant 0 : i32
    %c0_i32_0 = arith.constant 0 : i32
    return %arg0, %c0_i32 : i32, i32
  }
  func.func @transform_1(%arg0: i32) -> (i32, i32, i32) {
    %c0_i32 = arith.constant 0 : i32
    %c0_i32_0 = arith.constant 0 : i32
    %c0_i32_1 = arith.constant 0 : i32
    return %arg0, %c0_i32, %c0_i32_0 : i32, i32, i32
  }
  func.func @transform_2(%arg0: i32) -> (i32, i32) {
    %c0_i32 = arith.constant 0 : i32
    %c0_i32_0 = arith.constant 0 : i32
    %c0_i32_1 = arith.constant 0 : i32
    return %c0_i32, %c0_i32_0 : i32, i32
  }
  func.func @transform_3(%arg0: i32) -> (i32, i32) {
    %c0_i32 = arith.constant 0 : i32
    %c0_i32_0 = arith.constant 0 : i32
    %c0_i32_1 = arith.constant 0 : i32
    return %c0_i32, %c0_i32_0 : i32, i32
  }
  func.func @transform_4(%arg0: i32) -> (i32, i32, i32) {
    %c0_i32 = arith.constant 0 : i32
    %c0_i32_0 = arith.constant 0 : i32
    %c0_i32_1 = arith.constant 0 : i32
    %c0_i32_2 = arith.constant 0 : i32
    return %c0_i32, %c0_i32_0, %c0_i32_1 : i32, i32, i32
  }
  func.func @transform_5(%arg0: i32) -> (i32, i32, i32) {
    %c0_i32 = arith.constant 0 : i32
    %c0_i32_0 = arith.constant 0 : i32
    %c0_i32_1 = arith.constant 0 : i32
    %c0_i32_2 = arith.constant 0 : i32
    return %c0_i32, %c0_i32_0, %c0_i32_1 : i32, i32, i32
  }
  func.func @transform_6(%arg0: i32) -> (i32, i32, i32) {
    %c0_i32 = arith.constant 0 : i32
    %c0_i32_0 = arith.constant 0 : i32
    %c0_i32_1 = arith.constant 0 : i32
    %c0_i32_2 = arith.constant 0 : i32
    return %c0_i32, %c0_i32_0, %c0_i32_1 : i32, i32, i32
  }
  func.func @transform_7(%arg0: i32) -> (i32, i32, i32) {
    %c0_i32 = arith.constant 0 : i32
    %c0_i32_0 = arith.constant 0 : i32
    %c0_i32_1 = arith.constant 0 : i32
    %c0_i32_2 = arith.constant 0 : i32
    return %c0_i32, %c0_i32_0, %c0_i32_1 : i32, i32, i32
  }
  func.func @transform_8(%arg0: i32) -> (i32, i32, i32) {
    %c0_i32 = arith.constant 0 : i32
    %c0_i32_0 = arith.constant 0 : i32
    %c0_i32_1 = arith.constant 0 : i32
    %c0_i32_2 = arith.constant 0 : i32
    return %c0_i32, %c0_i32_0, %c0_i32_1 : i32, i32, i32
  }
  func.func @transform_9(%arg0: i32) -> (i32, i32, i32) {
    %c0_i32 = arith.constant 0 : i32
    %c0_i32_0 = arith.constant 0 : i32
    %c0_i32_1 = arith.constant 0 : i32
    %c0_i32_2 = arith.constant 0 : i32
    return %c0_i32, %c0_i32_0, %c0_i32_1 : i32, i32, i32
  }
  func.func @transform_10(%arg0: i32) -> (i32, i32, i32) {
    %c0_i32 = arith.constant 0 : i32
    %c0_i32_0 = arith.constant 0 : i32
    %c0_i32_1 = arith.constant 0 : i32
    %c0_i32_2 = arith.constant 0 : i32
    return %c0_i32, %c0_i32_0, %c0_i32_1 : i32, i32, i32
  }
  func.func @transform_11(%arg0: i32) -> (i32, i32, i32) {
    %c0_i32 = arith.constant 0 : i32
    %c0_i32_0 = arith.constant 0 : i32
    %c0_i32_1 = arith.constant 0 : i32
    %c0_i32_2 = arith.constant 0 : i32
    return %c0_i32, %c0_i32_0, %c0_i32_1 : i32, i32, i32
  }
  func.func @transform_12(%arg0: i32) -> (i32, i32, i32) {
    %c0_i32 = arith.constant 0 : i32
    %c0_i32_0 = arith.constant 0 : i32
    %c0_i32_1 = arith.constant 0 : i32
    %c0_i32_2 = arith.constant 0 : i32
    return %c0_i32, %c0_i32_0, %c0_i32_1 : i32, i32, i32
  }
  func.func @transform_13(%arg0: i32) -> (i32, i32, i32) {
    %c0_i32 = arith.constant 0 : i32
    %c0_i32_0 = arith.constant 0 : i32
    %c0_i32_1 = arith.constant 0 : i32
    %c0_i32_2 = arith.constant 0 : i32
    return %c0_i32, %c0_i32_0, %c0_i32_1 : i32, i32, i32
  }
  func.func @transform_14(%arg0: i32) -> (i32, i32, i32) {
    %c0_i32 = arith.constant 0 : i32
    %c0_i32_0 = arith.constant 0 : i32
    %c0_i32_1 = arith.constant 0 : i32
    %c0_i32_2 = arith.constant 0 : i32
    return %c0_i32, %c0_i32_0, %c0_i32_1 : i32, i32, i32
  }
  func.func @transform_15(%arg0: i32) -> (i32, i32, i32) {
    %c0_i32 = arith.constant 0 : i32
    %c0_i32_0 = arith.constant 0 : i32
    %c0_i32_1 = arith.constant 0 : i32
    %c0_i32_2 = arith.constant 0 : i32
    return %c0_i32, %c0_i32_0, %c0_i32_1 : i32, i32, i32
  }
  func.func @transform_16(%arg0: i32) -> (i32, i32) {
    %c0_i32 = arith.constant 0 : i32
    %c0_i32_0 = arith.constant 0 : i32
    %c0_i32_1 = arith.constant 0 : i32
    return %c0_i32, %c0_i32_0 : i32, i32
  }
  func.func @transform_17(%arg0: i32) -> (i32, i32) {
    %c0_i32 = arith.constant 0 : i32
    %c0_i32_0 = arith.constant 0 : i32
    %c0_i32_1 = arith.constant 0 : i32
    return %c0_i32, %c0_i32_0 : i32, i32
  }
  func.func @transform_18(%arg0: i32) -> (i32, i32) {
    %c0_i32 = arith.constant 0 : i32
    %c0_i32_0 = arith.constant 0 : i32
    %c0_i32_1 = arith.constant 0 : i32
    return %c0_i32, %c0_i32_0 : i32, i32
  }
  func.func @transform_19(%arg0: i32) -> (i32, i32) {
    %c0_i32 = arith.constant 0 : i32
    %c0_i32_0 = arith.constant 0 : i32
    %c0_i32_1 = arith.constant 0 : i32
    return %c0_i32, %c0_i32_0 : i32, i32
  }
  func.func @transform_20(%arg0: i32) -> (i32, i32, i32) {
    %c0_i32 = arith.constant 0 : i32
    %c0_i32_0 = arith.constant 0 : i32
    %c0_i32_1 = arith.constant 0 : i32
    return %arg0, %c0_i32, %c0_i32_0 : i32, i32, i32
  }
}

</mosaic_0001>

<bundles_post_ra>
// kernel: bert_classifier_forward.1
= control target key start
LH: loop header
LB: loop body
LE: loop exit
PB: predicated region body
PF: predicated region fallthrough
CT: control target
= control target key end

     0   :  { %s3096_s0 = inlined_call_operand.vmem [shape: f32[16,128], index: 0, kind: input, shape index: {}]   ;;  %s3097_s1 = inlined_call_operand.vmem [shape: f32[2,1,8], index: 1, kind: input, shape index: {}]   ;;  %s3098_s2 = inlined_call_operand.vmem [shape: f32[1,128], index: 2, kind: input, shape index: {}]   ;;  %s3099_s3 = inlined_call_operand.vmem [shape: f32[1,128], index: 3, kind: input, shape index: {}]   ;;  %s3100_s4 = inlined_call_operand.hbm [shape: f32[2,128,384], index: 4, kind: input, shape index: {}]   ;;  %s3101_s5 = inlined_call_operand.vmem [shape: f32[2,1,384], index: 5, kind: input, shape index: {}]   ;;  %s3102_s6 = inlined_call_operand.hbm [shape: f32[2,128,128], index: 6, kind: input, shape index: {}]   ;;  %s3103_s7 = inlined_call_operand.vmem [shape: f32[2,1,128], index: 7, kind: input, shape index: {}]   ;;  %s3104_s8 = inlined_call_operand.vmem [shape: f32[2,1,128], index: 8, kind: input, shape index: {}]   ;;  %s3105_s9 = inlined_call_operand.vmem [shape: f32[2,1,128], index: 9, kind: input, shape index: {}]   ;;  %s3106_s10 = inlined_call_operand.hbm [shape: f32[2,128,256], index: 10, kind: input, shape index: {}]   ;;  %s3107_s11 = inlined_call_operand.vmem [shape: f32[2,1,256], index: 11, kind: input, shape index: {}]   ;;  %s3108_s12 = inlined_call_operand.hbm [shape: f32[2,256,128], index: 12, kind: input, shape index: {}]   ;;  %s3109_s13 = inlined_call_operand.vmem [shape: f32[2,1,128], index: 13, kind: input, shape index: {}]   ;;  %s3110_s14 = inlined_call_operand.vmem [shape: f32[2,1,128], index: 14, kind: input, shape index: {}]   ;;  %s3111_s15 = inlined_call_operand.vmem [shape: f32[2,1,128], index: 15, kind: input, shape index: {}]   ;;  %s3112_s16 = inlined_call_operand.vmem [shape: f32[128,128], index: 16, kind: input, shape index: {}]   ;;  %s3113_s17 = inlined_call_operand.vmem [shape: f32[1,128], index: 17, kind: input, shape index: {}]   ;;  %s3114_s18 = inlined_call_operand.vmem [shape: f32[128,128], index: 18, kind: input, shape index: {}]   ;;  %s3115_s19 = inlined_call_operand.vmem [shape: f32[1,128], index: 19, kind: input, shape index: {}]   ;;  %s3116_s20 = inlined_call_operand.vmem [shape: f32[2,8,128], index: 20, kind: output, shape index: {}]  }
   0x1   :  { %3120 = sst [smem:[#allocation13_spill]] %s3096_s0 }
   0x2   :  { %3121 = sst [smem:[#allocation14_spill]] %s3097_s1 }
   0x3   :  { %3122 = sst [smem:[#allocation15_spill]] %s3098_s2 }
   0x4   :  { %3123 = sst [smem:[#allocation16_spill]] %s3099_s3 }
   0x5   :  { %3124 = sst [smem:[#allocation17_spill]] %s3100_s4 }
   0x6   :  { %3125 = sst [smem:[#allocation18_spill]] %s3102_s6 }
   0x7   :  { %3126 = sst [smem:[#allocation19_spill]] %s3113_s17 }
   0x8   :  { %3127 = sst [smem:[#allocation20_spill]] %s3114_s18 }
   0x9   :  { %3128 = sst [smem:[#allocation21_spill]] %s3115_s19 }
   0xa   :  { %3129 = sst [smem:[#allocation22_spill]] %s3116_s20 }
   0xb   :  { %25 = vsyncpa [#allocation3], 0 }
   0xc   :  { %26 = vsyncpa [#allocation5], 0 }
   0xd   :  { %27 = vsyncpa [#allocation8], 0  ;;  %s2702_s1 = smov 0  }
   0xe LB: > { %3130 = sst [smem:[#allocation12_spill]] %s2581_s1  ;;  %s2711_s2 = sadd.s32 4294967295, %s2581_s1   ;;  %s2581_s1 = sphi %s2702_s1, %s33_s1  }
   0xf   : > { %s3131_s6 = sld [smem:[#allocation18_spill]]  ;;  %p2268_p0 = scmp.ge.s32.totalorder %s2581_s1, 1 }
  0x10   : > { %p494_p1 = scmp.lt.s32.totalorder %s2581_s1, 3  ;;  %p2344_p2 = scmp.eq.s32.totalorder %s2711_s2, 0 }
  0x11   : > { %s2583_s3 = smov [#allocation4]   ;;  %s3133_s4 = sld [smem:[#allocation17_spill]] }
  0x12   : > { %p2716_p3 = pnand %p2268_p0, %p494_p1  ;;  %s530_s26 = sshll.u32 %s2583_s3, 4  ;;  %s531_s26 = int_to_ptr.vmem [resolvable:$true] %s530_s26 }
  0x13   : > { %s2584_s0 = smov [#allocation2]   ;;  %s2585_s22 = smov 128  }
  0x14   : > { %p2331_p4 = pneg %p2716_p3  ;;  %s513_s21 = sshll.u32 %s2584_s0, 4  ;;  %s514_s21 = int_to_ptr.vmem [resolvable:$true] %s513_s21 }
  0x15   : > { %s528_s24 = sshll.u32 %s3131_s6, 4  ;;  %s2586_s23 = smov 8   ;;  %s529_s24 = int_to_ptr.hbm [resolvable:$true] %s528_s24 }
  0x16   : > { %p2727_p5 = pnand %p2344_p2, %p2331_p4  ;;  %s551_s27 = sshll.u32 %s3106_s10, 4  ;;  %s552_s27 = int_to_ptr.hbm [resolvable:$true] %s551_s27 }
  0x17   : > { %s511_s29 = sshll.u32 %s3133_s4, 4  ;;  %s2587_s28 = smov 384   ;;  %s512_s29 = int_to_ptr.hbm [resolvable:$true] %s511_s29 }
  0x18   : > { %2337 = dma.hbm_to_vmem [thread:$0]  (!%p2727_p5), %s529_s24, 4096, %s531_s26, [#allocation5], %s2585_s22, %s2585_s22, %s2586_s23  }
  0x19   : > { %s2588_s4 = smov 24   ;;  %s2589_s1 = smov [#allocation6]  }
  0x1a   : > { %2334 = dma.hbm_to_vmem [thread:$0]  (!%p2727_p5), %s512_s29, 12288, %s514_s21, [#allocation3], %s2587_s28, %s2587_s28, %s2588_s4  }
  0x1b   : > { %s553_s20 = sshll.u32 %s2589_s1, 4  ;;  %s2590_s19 = smov 256   ;;  %s554_s20 = int_to_ptr.vmem [resolvable:$true] %s553_s20 }
  0x1c   : > { %s2591_s0 = smov 16   ;;  %s568_s24 = sshll.u32 %s3108_s12, 4  ;;  %s569_s24 = int_to_ptr.hbm [resolvable:$true] %s568_s24 }
  0x1d   : > { %2340 = dma.hbm_to_vmem [thread:$0]  (!%p2727_p5), %s552_s27, 8192, %s554_s20, [#allocation5], %s2590_s19, %s2590_s19, %s2591_s0  }
  0x1e   : > { %s2592_s6 = smov [#allocation7]   ;;  %620 = sbr.rel (%p2716_p3) target bundleno = 5328 (0x14d0), region = 100 }
  0x1f   : > { %s570_s26 = sshll.u32 %s2592_s6, 4  ;;  %s571_s26 = int_to_ptr.vmem [resolvable:$true] %s570_s26 }
  0x20   : > { %2343 = dma.hbm_to_vmem [thread:$0]  (!%p2727_p5), %s569_s24, 8192, %s571_s26, [#allocation8], %s2585_s22, %s2585_s22, %s2586_s23  }
  0x23   : > { %2568 = dma.done.wait (%p2344_p2), [#allocation3], 12288  }
  0x24   : > { %2570 = vsyncadd (%p2344_p2), [#allocation3], 4294955008 }
  0x25   : > { %2572 = dma.done.wait (%p2344_p2), [#allocation5], 12288  }
  0x26   : > { %2574 = vsyncadd (%p2344_p2), [#allocation5], 4294955008 }
  0x27   : > { %2576 = dma.done.wait (%p2344_p2), [#allocation8], 8192  }
  0x28   : > { %2578 = vsyncadd (%p2344_p2), [#allocation8], 4294959104  ;;  %p695_p6 = scmp.lt.s32.totalorder %s2711_s2, 1  ;;  %s3135_s20 = sld [smem:[#allocation13_spill]]  ;;  %v2593_v1 = vmov 128.0   ;;  %v793_v2 = vld [vmem:[#allocation2 + $0x168] sm:$0xff] }
  0x29   : > { %s3136_s30 = sld [smem:[#allocation14_spill]]  ;;  %2389 = vrcp.f32 %v2593_v1  ;;  %v794_v3 = vld [vmem:[#allocation2 + $0x170] sm:$0xff]  ;;  %v795_v4 = vld [vmem:[#allocation2 + $0x178] sm:$0xff]  ;;  %804 = vmatpush.msra.mxu0 %v793_v2  ;;  %v792_v7 = vld [vmem:[#allocation2 + $0x160] sm:$0xff]  ;;  %vm864_vm4 = vcmask 261120   ;;  %s2594_s6 = smov 96  }
  0x2a   : > { %s3145_s2 = smov (!%p695_p6, %s2711_s2), 1  ;;  %824 = vmatpush.msra.mxu1 %v794_v3  ;;  %v790_v5 = vld [vmem:[#allocation2 + $0x150] sm:$0xff]  ;;  %v791_v6 = vld [vmem:[#allocation2 + $0x158] sm:$0xff]  ;;  %844 = vmatpush.msra.mxu2 %v795_v4  ;;  %v788_v19 = vld [vmem:[#allocation2 + $0x140] sm:$0xff]  ;;  %s3137_s3 = sld [smem:[#allocation15_spill]]  ;;  %vm891_vm5 = vcmask 64512  }
  0x2b   : > { %s2279_s17 = sshll.u32 %s3145_s2, 3  ;;  %805 = vmatpush.msra.mxu0 %v790_v5  ;;  %v787_v18 = vld [vmem:[#allocation2 + $0x138] sm:$0xff]  ;;  %v789_v20 = vld [vmem:[#allocation2 + $0x148] sm:$0xff]  ;;  %v784_v21 = vld [vmem:[#allocation2 + $0x120] sm:$0xff]  ;;  %s3138_s4 = sld [smem:[#allocation16_spill]]  ;;  %vm1135_vm6 = vcmask 523264  }
  0x2c   : > { %825 = vmatpush.msra.mxu1 %v791_v6  ;;  %845 = vmatpush.msra.mxu2 %v792_v7  ;;  %v785_v22 = vld [vmem:[#allocation2 + $0x128] sm:$0xff]  ;;  %v786_v23 = vld [vmem:[#allocation2 + $0x130] sm:$0xff]  ;;  %v783_v26 = vld [vmem:[#allocation2 + $0x118] sm:$0xff]  ;;  %s2595_s19 = smov 64   ;;  %vm1137_vm7 = vcmask 785408  }
  0x2d   : > { %806 = vmatpush.msra.mxu0 %v787_v18  ;;  %v781_v24 = vld [vmem:[#allocation2 + $0x108] sm:$0xff]  ;;  %v782_v25 = vld [vmem:[#allocation2 + $0x110] sm:$0xff]  ;;  %v779_v28 = vld [vmem:[#allocation2 + $0xf8] sm:$0xff] }
  0x2e   : > { %s698_s1 = scalar_lea.vmem %s3135_s20, %s2279_s17  ;;  %826 = vmatpush.msra.mxu1 %v788_v19  ;;  %846 = vmatpush.msra.mxu2 %v789_v20  ;;  %v778_v27 = vld [vmem:[#allocation2 + $0xf0] sm:$0xff]  ;;  %v780_v29 = vld [vmem:[#allocation2 + $0x100] sm:$0xff]  ;;  %v775_v30 = vld [vmem:[#allocation2 + $0xd8] sm:$0xff]  ;;  %s2596_s20 = smov 32  }
  0x2f   : > { %s701_s21 = scalar_lea.vmem %s3136_s30, %s3145_s2  ;;  %v710_v0 = vld [vmem:[%s698_s1] sm:$0xff]  ;;  %v2390_v8 = vpop.eup %2389  ;;  %807 = vmatpush.msra.mxu0 %v784_v21  ;;  %v777_v32 = vld [vmem:[#allocation2 + $0xe8] sm:$0xff]  ;;  %v774_v35 = vld [vmem:[#allocation2 + $0xd0] sm:$0xff]  ;;  %s3140_s1 = sld [smem:[#allocation19_spill]] }
  0x30   : > { %713 = vadd.xlane.f32.xlu0 %v710_v0  ;;  %v716_v9 = vmul.f32 128.0, %v2390_v8  ;;  %vm720_vm0 = vweird.f32 %v2390_v8  ;;  %827 = vmatpush.msra.mxu1 %v785_v22  ;;  %v776_v31 = vld [vmem:[#allocation2 + $0xe0] sm:$0xff]  ;;  %v773_v34 = vld [vmem:[#allocation2 + $0xc8] sm:$0xff]  ;;  %v770_v37 = vld [vmem:[#allocation2 + $0xb0] sm:$0xff] }
  0x31   : > { %847 = vmatpush.msra.mxu2 %v786_v23  ;;  %808 = vmatpush.msra.mxu0 %v781_v24  ;;  %v772_v33 = vld [vmem:[#allocation2 + $0xc0] sm:$0xff]  ;;  %v769_v36 = vld [vmem:[#allocation2 + $0xa8] sm:$0xff]  ;;  %v771_v38 = vld [vmem:[#allocation2 + $0xb8] sm:$0xff] }
  0x32   : > { %v717_v10 = vsub.f32 1.0, %v716_v9  ;;  %828 = vmatpush.msra.mxu1 %v782_v25  ;;  %v766_v39 = vld [vmem:[#allocation2 + $0x90] sm:$0xff]  ;;  %v767_v40 = vld [vmem:[#allocation2 + $0x98] sm:$0xff]  ;;  %v768_v41 = vld [vmem:[#allocation2 + $0xa0] sm:$0xff] }
  0x33   : > { %848 = vmatpush.msra.mxu2 %v783_v26  ;;  %809 = vmatpush.msra.mxu0 %v778_v27  ;;  %v763_v42 = vld [vmem:[#allocation2 + $0x78] sm:$0xff]  ;;  %v764_v43 = vld [vmem:[#allocation2 + $0x80] sm:$0xff]  ;;  %v765_v44 = vld [vmem:[#allocation2 + $0x88] sm:$0xff] }
  0x34   : > { %v718_v11 = vmul.f32 %v2390_v8, %v717_v10  ;;  %829 = vmatpush.msra.mxu1 %v779_v28  ;;  %v760_v45 = vld [vmem:[#allocation2 + $0x60] sm:$0xff]  ;;  %v761_v46 = vld [vmem:[#allocation2 + $0x68] sm:$0xff]  ;;  %v762_v47 = vld [vmem:[#allocation2 + $0x70] sm:$0xff] }
  0x35   : > { %849 = vmatpush.msra.mxu2 %v780_v29  ;;  %810 = vmatpush.msra.mxu0 %v775_v30  ;;  %v757_v48 = vld [vmem:[#allocation2 + $0x48] sm:$0xff]  ;;  %v758_v49 = vld [vmem:[#allocation2 + $0x50] sm:$0xff]  ;;  %v759_v50 = vld [vmem:[#allocation2 + $0x58] sm:$0xff] }
  0x36   : > { %v719_v12 = vadd.f32 %v2390_v8, %v718_v11  ;;  %830 = vmatpush.msra.mxu1 %v776_v31  ;;  %v754_v51 = vld [vmem:[#allocation2 + $0x30] sm:$0xff]  ;;  %v755_v52 = vld [vmem:[#allocation2 + $0x38] sm:$0xff]  ;;  %v756_v53 = vld [vmem:[#allocation2 + $0x40] sm:$0xff] }
  0x37   : > { %850 = vmatpush.msra.mxu2 %v777_v32  ;;  %811 = vmatpush.msra.mxu0 %v772_v33  ;;  %v751_v54 = vld [vmem:[#allocation2 + $0x18] sm:$0xff]  ;;  %v752_v55 = vld [vmem:[#allocation2 + $0x20] sm:$0xff]  ;;  %v753_v56 = vld [vmem:[#allocation2 + $0x28] sm:$0xff] }
  0x38   : > { %v2773_v13 = vsel %vm720_vm0, %v2390_v8, %v719_v12  ;;  %831 = vmatpush.msra.mxu1 %v773_v34  ;;  %v748_v57 = vld [vmem:[#allocation2] sm:$0xff]  ;;  %v749_v58 = vld [vmem:[#allocation2 + $0x8] sm:$0xff]  ;;  %v750_v59 = vld [vmem:[#allocation2 + $0x10] sm:$0xff] }
  0x39   : > { %851 = vmatpush.msra.mxu2 %v774_v35  ;;  %812 = vmatpush.msra.mxu0 %v769_v36  ;;  %v2375_v5 = vld [vmem:[%s3137_s3] ss:$0 sm:$0xff] }
  0x3a   : > { %832 = vmatpush.msra.mxu1 %v770_v37  ;;  %v2376_v8 = vld [vmem:[%s3138_s4] ss:$0 sm:$0xff]  ;;  %s3139_s4 = sld [smem:[#allocation20_spill]] }
  0x3b   : > { %852 = vmatpush.msra.mxu2 %v771_v38  ;;  %813 = vmatpush.msra.mxu0 %v766_v39  ;;  %v796_v11 = vld [vmem:[%s3101_s5] sm:$0x7] }
  0x3c   : > { %833 = vmatpush.msra.mxu1 %v767_v40  ;;  %v799_v12 = vperm.slane %v796_v11, 1  ;;  %v800_v19 = vperm.slane %v796_v11, 2  ;;  %v2811_v23 = vld [vmem:[%s701_s21] ss:$0 sm:$0xff]  ;;  %s3142_s21 = sld [smem:[#allocation22_spill]] }
  0x3d   : > { %853 = vmatpush.msra.mxu2 %v768_v41  ;;  %814 = vmatpush.msra.mxu0 %v763_v42 }
  0x3e   : > { %834 = vmatpush.msra.mxu1 %v764_v43 }
  0x3f   : > { %854 = vmatpush.msra.mxu2 %v765_v44  ;;  %815 = vmatpush.msra.mxu0 %v760_v45 }
  0x40   : > { %835 = vmatpush.msra.mxu1 %v761_v46 }
  0x41   : > { %855 = vmatpush.msra.mxu2 %v762_v47  ;;  %816 = vmatpush.msra.mxu0 %v757_v48 }
  0x42   : > { %836 = vmatpush.msra.mxu1 %v758_v49  ;;  %s705_s22 = scalar_lea.vmem %s3142_s21, %s2279_s17 }
  0x43   : > { %856 = vmatpush.msra.mxu2 %v759_v50  ;;  %817 = vmatpush.msra.mxu0 %v754_v51 }
  0x44   : > { %837 = vmatpush.msra.mxu1 %v755_v52 }
  0x45   : > { %857 = vmatpush.msra.mxu2 %v756_v53  ;;  %818 = vmatpush.msra.mxu0 %v751_v54 }
  0x46   : > { %838 = vmatpush.msra.mxu1 %v752_v55 }
  0x47   : > { %858 = vmatpush.msra.mxu2 %v753_v56  ;;  %819 = vmatpush.msra.mxu0 %v748_v57 }
  0x48   : > { %839 = vmatpush.msra.mxu1 %v749_v58 }
  0x49   : > { %859 = vmatpush.msra.mxu2 %v750_v59 }
  0xa3   : > { %v714_v14 = vpop.xlane.xlu0 %713 }
  0xa4   : > { %v722_v15 = vmul.f32 %v2773_v13, %v714_v14  ;;  %v798_v14 = vperm.slane %v796_v11, 0 }
  0xa6   : > { %v2776_v16 = vsub.f32 %v710_v0, %v722_v15 }
  0xa8   : > { %v724_v17 = vmul.f32 %v2776_v16, %v2776_v16 }
  0xaa   : > { %725 = vadd.xlane.f32.xlu0 %v724_v17 }
 0x11d   : > { %v726_v60 = vpop.xlane.xlu0 %725 }
 0x11e   : > { %v727_v61 = vmul.f32 %v726_v60, %v2773_v13 }
 0x120   : > { %v728_v62 = vadd.f32 1e-12, %v727_v61 }
 0x122   : > { %2391 = vrsqrt.f32 %v728_v62  ;;  %vm735_vm2 = vweird.f32 %v728_v62 }
 0x128   : > { %v2392_v63 = vpop.eup %2391 }
 0x129   : > { %v730_v0 = vmul.f32 %v2392_v63, %v728_v62  ;;  %vm736_vm1 = vweird.f32 %v2392_v63 }
 0x12a   : > { %vm737_vm3 = vmor %vm735_vm2, %vm736_vm1 }
 0x12b   : > { %v731_v1 = vmul.f32 %v2392_v63, %v730_v0 }
 0x12d   : > { %v732_v2 = vmul.f32 0.5, %v731_v1 }
 0x12f   : > { %v733_v3 = vsub.f32 1.5, %v732_v2 }
 0x131   : > { %v734_v4 = vmul.f32 %v2392_v63, %v733_v3 }
 0x133   : > { %v738_v6 = vsel %vm737_vm3, %v2392_v63, %v734_v4 }
 0x134   : > { %v739_v7 = vmul.f32 %v738_v6, %v2776_v16 }
 0x136   : > { %v743_v9 = vmul.f32 %v2375_v5, %v739_v7 }
 0x138   : > { %v2788_v10 = vadd.f32 %v2376_v8, %v743_v9 }
 0x13a   : > { %820 = vmatmul.f32.vlgmr.msra.gmra.mxu0 %v2788_v10  ;;  %840 = vmatmul.f32.vlgmr.msra.gmra.mxu1 %v2788_v10 }
 0x13b   : > { %860 = vmatmul.f32.vlgmr.msra.gmra.mxu2 %v2788_v10 }
 0x1b7   : > { %v841_v15 = vpop.f32.mrf.mxu1  ;;  %v821_v16 = vpop.f32.mrf.mxu0 }
 0x1b8   : > { %v842_v17 = vadd.f32 %v841_v15, %v799_v12  ;;  %v822_v18 = vadd.f32 %v821_v16, %v798_v14 }
 0x1ba   : > { %928 = vrot.lane.b32.xlu2 %v842_v17, %s2594_s6  ;;  %2281 = vmatpush.xpose.msk.msrb.mxu2 %vm864_vm4, %v842_v17 }
 0x1bd   : > { %2282 = vmatmul.msk.f32.vlgmr.msrb.gmra.mxu2 %vm864_vm4, %v822_v18 }
 0x1be   : > { %v861_v20 = vpop.f32.mrf.mxu2 }
 0x1bf   : > { %v2799_v21 = vadd.f32 %v861_v20, %v800_v19  ;;  %v1152_v19 = vld [vmem:[#allocation4 + $0x68] sm:$0xff]  ;;  %v1151_v20 = vld [vmem:[#allocation4 + $0x60] sm:$0xff] }
 0x1c1   : > { %921 = vmatpush.msra.mxu3 %v2799_v21 }
 0x1c2   : > { %926 = vrot.lane.b32.xlu2 %v822_v18, %s2594_s6 }
 0x1ca   : > { %966 = vrot.lane.b32.xlu2 %v2799_v21, %s2594_s6 }
 0x214   : > { %v929_v22 = vpop.permute.xlu2 %928 }
 0x215   : > { %2284 = vmatpush.xpose.msk.msrb.mxu3 %vm864_vm4, %v929_v22  ;;  %v1149_v22 = vld [vmem:[#allocation4 + $0x50] sm:$0xff] }
 0x21c   : > { %v927_v32 = vpop.permute.xlu2 %926 }
 0x224   : > { %v967_v36 = vpop.permute.xlu2 %966 }
 0x240   : > { %v888_v24 = vpop.f32.mrf.mxu2 }
 0x241   : > { %v889_v25 = vadd.f32 %v2811_v23, %v888_v24  ;;  %v1148_v24 = vld [vmem:[#allocation4 + $0x48] sm:$0xff] }
 0x243   : > { %v892_v26 = vsel %vm891_vm5, %v889_v25, -inf }
 0x244   : > { %893 = vmax.xlane.f32.xlu1 %v892_v26  ;;  %v1146_v26 = vld [vmem:[#allocation4 + $0x38] sm:$0xff] }
 0x2b7   : > { %v894_v27 = vpop.xlane.xlu1 %893 }
 0x2b8   : > { %v895_v28 = vsub.f32 %v889_v25, %v894_v27  ;;  %v1147_v25 = vld [vmem:[#allocation4 + $0x40] sm:$0xff]  ;;  %v1145_v27 = vld [vmem:[#allocation4 + $0x30] sm:$0xff] }
 0x2ba   : > { %v896_v29 = vmul.f32 1.442695, %v895_v28  ;;  %v1144_v28 = vld [vmem:[#allocation4 + $0x28] sm:$0xff] }
 0x2bc   : > { %2393 = vpow2.f32 %v896_v29  ;;  %v1143_v29 = vld [vmem:[#allocation4 + $0x20] sm:$0xff] }
 0x2c2   : > { %v2394_v30 = vpop.eup %2393 }
 0x2c3   : > { %v898_v31 = vsel %vm891_vm5, %v2394_v30, 0.0 }
 0x2c4   : > { %899 = vadd.xlane.f32.xlu1 %v898_v31  ;;  %v1141_v31 = vld [vmem:[#allocation4 + $0x10] sm:$0xff] }
 0x337   : > { %v900_v33 = vpop.xlane.xlu1 %899 }
 0x338   : > { %2395 = vrcp.f32 %v900_v33 }
 0x33e   : > { %v2396_v34 = vpop.eup %2395 }
 0x33f   : > { %v902_v35 = vmul.f32 %v2396_v34, %v2394_v30  ;;  %v1142_v30 = vld [vmem:[#allocation4 + $0x18] sm:$0xff]  ;;  %v1139_v34 = vld [vmem:[#allocation4] sm:$0xff] }
 0x341   : > { %2283 = vmatmul.msk.f32.vlgmr.msra.gmra.mxu3 %vm891_vm5, %v902_v35 }
 0x342   : > { %987 = vmatpush.msra.mxu3 %v967_v36 }
 0x349   : > { %2285 = vmatmul.msk.f32.vlgmr.msrb.gmra.mxu3 %vm864_vm4, %v927_v32  ;;  %v1140_v32 = vld [vmem:[#allocation4 + $0x8] sm:$0xff] }
 0x3c4   : > { %v2818_v37 = vpop.f32.mrf.mxu3 }
 0x3cc   : > { %v951_v38 = vpop.f32.mrf.mxu3 }
 0x3cd   : > { %v952_v39 = vadd.f32 %v2811_v23, %v951_v38 }
 0x3cf   : > { %v954_v40 = vsel %vm891_vm5, %v952_v39, -inf }
 0x3d0   : > { %955 = vmax.xlane.f32.xlu0 %v954_v40 }
 0x3e4   : > { %994 = vrot.lane.b32.xlu0 %v842_v17, %s2595_s19 }
 0x443   : > { %v956_v41 = vpop.xlane.xlu0 %955 }
 0x444   : > { %v957_v42 = vsub.f32 %v952_v39, %v956_v41 }
 0x446   : > { %v958_v43 = vmul.f32 1.442695, %v957_v42  ;;  %v2377_v42 = vld [vmem:[%s3103_s7] ss:$0 sm:$0xff] }
 0x448   : > { %2397 = vpow2.f32 %v958_v43 }
 0x44e   : > { %v2398_v44 = vpop.eup %2397 }
 0x44f   : > { %v960_v45 = vsel %vm891_vm5, %v2398_v44, 0.0 }
 0x450   : > { %961 = vadd.xlane.f32.xlu1 %v960_v45 }
 0x456   : > { %v995_v46 = vpop.permute.xlu0 %994 }
 0x457   : > { %2287 = vmatpush.xpose.msk.msrb.mxu3 %vm864_vm4, %v995_v46  ;;  %v1240_v46 = vld [vmem:[#allocation6 + $0xf0] sm:$0xff] }
 0x458   : > { %1248 = vmatpush.msrb.mxu0 %v1240_v46  ;;  %v1332_v46 = vld [vmem:[#allocation7 + $0xd0] sm:$0xff] }
 0x469   : > { %992 = vrot.lane.b32.xlu1 %v822_v18, %s2595_s19 }
 0x471   : > { %1031 = vrot.lane.b32.xlu1 %v2799_v21, %s2595_s19 }
 0x479   : > { %1059 = vrot.lane.b32.xlu1 %v842_v17, %s2596_s20  ;;  %v1154_v17 = vld [vmem:[#allocation4 + $0x78] sm:$0xff] }
 0x481   : > { %1057 = vrot.lane.b32.xlu1 %v822_v18, %s2596_s20  ;;  %v1153_v18 = vld [vmem:[#allocation4 + $0x70] sm:$0xff] }
 0x4c3   : > { %v962_v47 = vpop.xlane.xlu1 %961 }
 0x4c4   : > { %2399 = vrcp.f32 %v962_v47  ;;  %v1241_v47 = vld [vmem:[#allocation6 + $0xf8] sm:$0xff] }
 0x4c5   : > { %1268 = vmatpush.msrb.mxu1 %v1241_v47  ;;  %v1315_v47 = vld [vmem:[#allocation7 + $0x48] sm:$0xff] }
 0x4ca   : > { %v2400_v48 = vpop.eup %2399 }
 0x4cb   : > { %v964_v49 = vmul.f32 %v2400_v48, %v2398_v44  ;;  %v1238_v48 = vld [vmem:[#allocation6 + $0xe0] sm:$0xff] }
 0x4cc   : > { %1249 = vmatpush.msrb.mxu0 %v1238_v48  ;;  %v1331_v48 = vld [vmem:[#allocation7 + $0xc8] sm:$0xff] }
 0x4cd   : > { %2286 = vmatmul.msk.f32.vlgmr.msra.gmra.mxu3 %vm891_vm5, %v964_v49 }
 0x4ce   : > { %1159 = vmatpush.msra.mxu3 %v1154_v17  ;;  %v1211_v17 = vld [vmem:[#allocation6 + $0x8] sm:$0xff] }
 0x4d0   : > { %1160 = vmatpush.msra.mxu3 %v1153_v18  ;;  %v1321_v18 = vld [vmem:[#allocation7 + $0x78] sm:$0xff] }
 0x4d2   : > { %1161 = vmatpush.msra.mxu3 %v1152_v19  ;;  %v1337_v19 = vld [vmem:[#allocation7 + $0xf8] sm:$0xff] }
 0x4d4   : > { %1162 = vmatpush.msra.mxu3 %v1151_v20  ;;  %v1320_v20 = vld [vmem:[#allocation7 + $0x70] sm:$0xff] }
 0x4db   : > { %v993_v50 = vpop.permute.xlu1 %992 }
 0x4dc   : > { %2288 = vmatmul.msk.f32.vlgmr.msrb.gmra.mxu3 %vm864_vm4, %v993_v50 }
 0x4e3   : > { %v1032_v51 = vpop.permute.xlu1 %1031 }
 0x4e4   : > { %1052 = vmatpush.msra.mxu2 %v1032_v51 }
 0x4eb   : > { %v1060_v52 = vpop.permute.xlu1 %1059 }
 0x4ec   : > { %2290 = vmatpush.xpose.msk.msrb.mxu2 %vm864_vm4, %v1060_v52 }
 0x4f3   : > { %v1058_v1 = vpop.permute.xlu1 %1057 }
 0x550   : > { %v989_v53 = vpop.f32.mrf.mxu3 }
 0x55f   : > { %v1017_v54 = vpop.f32.mrf.mxu3 }
 0x560   : > { %v1018_v55 = vadd.f32 %v2811_v23, %v1017_v54  ;;  %v1234_v54 = vld [vmem:[#allocation6 + $0xc0] sm:$0xff] }
 0x562   : > { %v1020_v56 = vsel %vm891_vm5, %v1018_v55, -inf }
 0x563   : > { %1021 = vmax.xlane.f32.xlu2 %v1020_v56  ;;  %v1232_v56 = vld [vmem:[#allocation6 + $0xb0] sm:$0xff] }
 0x5d6   : > { %v1022_v57 = vpop.xlane.xlu2 %1021 }
 0x5d7   : > { %v1023_v58 = vsub.f32 %v1018_v55, %v1022_v57  ;;  %v1235_v55 = vld [vmem:[#allocation6 + $0xc8] sm:$0xff]  ;;  %v1233_v57 = vld [vmem:[#allocation6 + $0xb8] sm:$0xff] }
 0x5d9   : > { %v1024_v59 = vmul.f32 1.442695, %v1023_v58  ;;  %v1230_v58 = vld [vmem:[#allocation6 + $0xa0] sm:$0xff] }
 0x5db   : > { %2401 = vpow2.f32 %v1024_v59  ;;  %v1231_v59 = vld [vmem:[#allocation6 + $0xa8] sm:$0xff] }
 0x5e1   : > { %v2402_v60 = vpop.eup %2401 }
 0x5e2   : > { %v1026_v61 = vsel %vm891_vm5, %v2402_v60, 0.0 }
 0x5e3   : > { %1027 = vadd.xlane.f32.xlu0 %v1026_v61  ;;  %v1229_v61 = vld [vmem:[#allocation6 + $0x98] sm:$0xff] }
 0x5f7   : > { %1123 = vrot.lane.b32.xlu0 %v989_v53, %s2596_s20  ;;  %v1236_v53 = vld [vmem:[#allocation6 + $0xd0] sm:$0xff] }
 0x5f8   : > { %1250 = vmatpush.msrb.mxu0 %v1236_v53  ;;  %v1328_v53 = vld [vmem:[#allocation7 + $0xb0] sm:$0xff] }
 0x5fa   : > { %1251 = vmatpush.msrb.mxu0 %v1234_v54  ;;  %v1327_v54 = vld [vmem:[#allocation7 + $0xa8] sm:$0xff] }
 0x5fc   : > { %1252 = vmatpush.msrb.mxu0 %v1232_v56  ;;  %v1326_v56 = vld [vmem:[#allocation7 + $0xa0] sm:$0xff] }
 0x5fe   : > { %1253 = vmatpush.msrb.mxu0 %v1230_v58  ;;  %v1325_v58 = vld [vmem:[#allocation7 + $0x98] sm:$0xff] }
 0x656   : > { %v1028_v62 = vpop.xlane.xlu0 %1027 }
 0x657   : > { %2403 = vrcp.f32 %v1028_v62  ;;  %v1226_v62 = vld [vmem:[#allocation6 + $0x80] sm:$0xff] }
 0x65d   : > { %v2404_v63 = vpop.eup %2403 }
 0x65e   : > { %v1030_v0 = vmul.f32 %v2404_v63, %v2402_v60  ;;  %v1228_v60 = vld [vmem:[#allocation6 + $0x90] sm:$0xff]  ;;  %v1227_v63 = vld [vmem:[#allocation6 + $0x88] sm:$0xff] }
 0x65f   : > { %1254 = vmatpush.msrb.mxu0 %v1228_v60  ;;  %v1324_v60 = vld [vmem:[#allocation7 + $0x90] sm:$0xff] }
 0x660   : > { %2289 = vmatmul.msk.f32.vlgmr.msra.gmra.mxu2 %vm891_vm5, %v1030_v0  ;;  %v1224_v0 = vld [vmem:[#allocation6 + $0x70] sm:$0xff] }
 0x661   : > { %1255 = vmatpush.msrb.mxu0 %v1226_v62  ;;  %v1323_v62 = vld [vmem:[#allocation7 + $0x88] sm:$0xff] }
 0x663   : > { %1256 = vmatpush.msrb.mxu0 %v1224_v0  ;;  %v1322_v0 = vld [vmem:[#allocation7 + $0x80] sm:$0xff] }
 0x668   : > { %2291 = vmatmul.msk.f32.vlgmr.msrb.gmra.mxu2 %vm864_vm4, %v1058_v1  ;;  %v1225_v1 = vld [vmem:[#allocation6 + $0x78] sm:$0xff] }
 0x669   : > { %v1124_v36 = vpop.permute.xlu0 %1123 }
 0x66a   : > { %v1134_v38 = vsel %vm864_vm4, %v2818_v37, %v1124_v36  ;;  %v1239_v37 = vld [vmem:[#allocation6 + $0xe8] sm:$0xff]  ;;  %v2378_v36 = vld [vmem:[%s3104_s8] ss:$0 sm:$0xff] }
 0x66b   : > { %1269 = vmatpush.msrb.mxu1 %v1239_v37  ;;  %v1314_v37 = vld [vmem:[#allocation7 + $0x40] sm:$0xff] }
 0x6e3   : > { %v1054_v2 = vpop.f32.mrf.mxu2 }
 0x6eb   : > { %v1082_v3 = vpop.f32.mrf.mxu2 }
 0x6ec   : > { %v1083_v4 = vadd.f32 %v2811_v23, %v1082_v3  ;;  %v1223_v3 = vld [vmem:[#allocation6 + $0x68] sm:$0xff] }
 0x6ee   : > { %v1085_v5 = vsel %vm891_vm5, %v1083_v4, -inf }
 0x6ef   : > { %1086 = vmax.xlane.f32.xlu2 %v1085_v5  ;;  %v1221_v5 = vld [vmem:[#allocation6 + $0x58] sm:$0xff] }
 0x707   : > { %1096 = vrot.lane.b32.xlu2 %v2799_v21, %s2596_s20  ;;  %v1150_v21 = vld [vmem:[#allocation4 + $0x58] sm:$0xff] }
 0x708   : > { %1163 = vmatpush.msra.mxu3 %v1150_v21  ;;  %v1336_v21 = vld [vmem:[#allocation7 + $0xf0] sm:$0xff] }
 0x70a   : > { %1164 = vmatpush.msra.mxu3 %v1149_v22  ;;  %v1319_v22 = vld [vmem:[#allocation7 + $0x68] sm:$0xff] }
 0x70c   : > { %1165 = vmatpush.msra.mxu3 %v1148_v24  ;;  %v1335_v24 = vld [vmem:[#allocation7 + $0xe8] sm:$0xff] }
 0x70e   : > { %1166 = vmatpush.msra.mxu3 %v1147_v25 }
 0x70f   : > { %1127 = vrot.lane.b32.xlu2 %v1054_v2, %s2595_s19  ;;  %v1222_v2 = vld [vmem:[#allocation6 + $0x60] sm:$0xff] }
 0x710   : > { %1167 = vmatpush.msra.mxu3 %v1146_v26  ;;  %1257 = vmatpush.msrb.mxu0 %v1222_v2 }
 0x712   : > { %1168 = vmatpush.msra.mxu3 %v1145_v27  ;;  %v1318_v27 = vld [vmem:[#allocation7 + $0x60] sm:$0xff] }
 0x714   : > { %1169 = vmatpush.msra.mxu3 %v1144_v28  ;;  %v1334_v28 = vld [vmem:[#allocation7 + $0xe0] sm:$0xff] }
 0x716   : > { %1170 = vmatpush.msra.mxu3 %v1143_v29 }
 0x718   : > { %1171 = vmatpush.msra.mxu3 %v1142_v30 }
 0x71a   : > { %1172 = vmatpush.msra.mxu3 %v1141_v31 }
 0x71c   : > { %1173 = vmatpush.msra.mxu3 %v1140_v32 }
 0x71e   : > { %1174 = vmatpush.msra.mxu3 %v1139_v34 }
 0x720   : > { %1362 = vmatpush.msrb.mxu3 %v1337_v19 }
 0x722   : > { %1363 = vmatpush.msrb.mxu3 %v1336_v21 }
 0x724   : > { %1364 = vmatpush.msrb.mxu3 %v1335_v24 }
 0x726   : > { %1365 = vmatpush.msrb.mxu3 %v1334_v28 }
 0x762   : > { %v1087_v6 = vpop.xlane.xlu2 %1086 }
 0x763   : > { %v1088_v7 = vsub.f32 %v1083_v4, %v1087_v6  ;;  %v1220_v4 = vld [vmem:[#allocation6 + $0x50] sm:$0xff]  ;;  %v1218_v6 = vld [vmem:[#allocation6 + $0x40] sm:$0xff] }
 0x764   : > { %1258 = vmatpush.msrb.mxu0 %v1220_v4 }
 0x765   : > { %v1089_v8 = vmul.f32 1.442695, %v1088_v7  ;;  %v1219_v7 = vld [vmem:[#allocation6 + $0x48] sm:$0xff] }
 0x766   : > { %1259 = vmatpush.msrb.mxu0 %v1218_v6 }
 0x767   : > { %2405 = vpow2.f32 %v1089_v8  ;;  %v1216_v8 = vld [vmem:[#allocation6 + $0x30] sm:$0xff] }
 0x768   : > { %1260 = vmatpush.msrb.mxu0 %v1216_v8 }
 0x76a   : > { %v1097_v9 = vpop.permute.xlu2 %1096 }
 0x76b   : > { %1117 = vmatpush.msra.mxu2 %v1097_v9  ;;  %v1217_v9 = vld [vmem:[#allocation6 + $0x38] sm:$0xff] }
 0x76d   : > { %v2406_v11 = vpop.eup %2405  ;;  %1342 = vmatpush.msrb.mxu2 %v1321_v18 }
 0x76e   : > { %v1091_v12 = vsel %vm891_vm5, %v2406_v11, 0.0 }
 0x76f   : > { %1092 = vadd.xlane.f32.xlu1 %v1091_v12  ;;  %v1215_v12 = vld [vmem:[#allocation6 + $0x28] sm:$0xff]  ;;  %1343 = vmatpush.msrb.mxu2 %v1320_v20 }
 0x771   : > { %1344 = vmatpush.msrb.mxu2 %v1319_v22 }
 0x772   : > { %v1128_v35 = vpop.permute.xlu2 %1127 }
 0x773   : > { %v1136_v39 = vsel %vm1135_vm6, %v1134_v38, %v1128_v35  ;;  %1345 = vmatpush.msrb.mxu2 %v1318_v27 }
 0x7e2   : > { %v1093_v14 = vpop.xlane.xlu1 %1092 }
 0x7e3   : > { %2407 = vrcp.f32 %v1093_v14  ;;  %v1212_v14 = vld [vmem:[#allocation6 + $0x10] sm:$0xff] }
 0x7e9   : > { %v2408_v15 = vpop.eup %2407 }
 0x7ea   : > { %v1095_v16 = vmul.f32 %v2408_v15, %v2406_v11  ;;  %v1214_v11 = vld [vmem:[#allocation6 + $0x20] sm:$0xff]  ;;  %v1213_v15 = vld [vmem:[#allocation6 + $0x18] sm:$0xff] }
 0x7eb   : > { %1261 = vmatpush.msrb.mxu0 %v1214_v11 }
 0x7ec   : > { %2292 = vmatmul.msk.f32.vlgmr.msra.gmra.mxu2 %vm891_vm5, %v1095_v16  ;;  %v1210_v16 = vld [vmem:[#allocation6] sm:$0xff] }
 0x7ed   : > { %1262 = vmatpush.msrb.mxu0 %v1212_v14 }
 0x7ef   : > { %1263 = vmatpush.msrb.mxu0 %v1210_v16 }
 0x86f   : > { %v1119_v33 = vpop.f32.mrf.mxu2 }
 0x870   : > { %1131 = vrot.lane.b32.xlu2 %v1119_v33, %s2594_s6 }
 0x8ca   : > { %v1132_v40 = vpop.permute.xlu2 %1131 }
 0x8cb   : > { %v1138_v41 = vsel %vm1137_vm7, %v1136_v39, %v1132_v40  ;;  %v2379_v40 = vld [vmem:[%s3105_s9] ss:$0 sm:$0xff] }
 0x8cc   : > { %1175 = vmatmul.f32.vlgmr.msra.gmra.mxu3 %v1138_v41 }
 0x94f   : > { %v1176_v43 = vpop.f32.mrf.mxu3 }
 0x950   : > { %v1177_v44 = vadd.f32 %v2377_v42, %v1176_v43  ;;  %v1317_v43 = vld [vmem:[#allocation7 + $0x58] sm:$0xff] }
 0x951   : > { %1346 = vmatpush.msrb.mxu2 %v1317_v43 }
 0x952   : > { %v1179_v45 = vadd.f32 %v1177_v44, %v2788_v10  ;;  %v1237_v10 = vld [vmem:[#allocation6 + $0xd8] sm:$0xff] }
 0x953   : > { %1270 = vmatpush.msrb.mxu1 %v1237_v10  ;;  %v1333_v44 = vld [vmem:[#allocation7 + $0xd8] sm:$0xff]  ;;  %v1311_v10 = vld [vmem:[#allocation7 + $0x28] sm:$0xff] }
 0x954   : > { %1182 = vadd.xlane.f32.xlu0 %v1179_v45  ;;  %1366 = vmatpush.msrb.mxu3 %v1333_v44 }
 0x955   : > { %1271 = vmatpush.msrb.mxu1 %v1235_v55  ;;  %v1310_v55 = vld [vmem:[#allocation7 + $0x20] sm:$0xff] }
 0x956   : > { %1367 = vmatpush.msrb.mxu3 %v1332_v46  ;;  %v1453_v46 = vld [vmem:[#allocation2 + $0x2b8] sm:$0xff] }
 0x957   : > { %1272 = vmatpush.msrb.mxu1 %v1233_v57  ;;  %v1309_v57 = vld [vmem:[#allocation7 + $0x18] sm:$0xff] }
 0x958   : > { %1368 = vmatpush.msrb.mxu3 %v1331_v48  ;;  %v1455_v48 = vld [vmem:[#allocation2 + $0x2c8] sm:$0xff] }
 0x959   : > { %1273 = vmatpush.msrb.mxu1 %v1231_v59  ;;  %v1308_v59 = vld [vmem:[#allocation7 + $0x10] sm:$0xff] }
 0x95b   : > { %1274 = vmatpush.msrb.mxu1 %v1229_v61  ;;  %v1307_v61 = vld [vmem:[#allocation7 + $0x8] sm:$0xff] }
 0x95d   : > { %1275 = vmatpush.msrb.mxu1 %v1227_v63  ;;  %v1306_v63 = vld [vmem:[#allocation7] sm:$0xff] }
 0x95f   : > { %1276 = vmatpush.msrb.mxu1 %v1225_v1  ;;  %v1242_v1 = vld [vmem:[%s3107_s11] sm:$0x3] }
 0x960   : > { %v1244_v2 = vperm.slane %v1242_v1, 0 }
 0x961   : > { %1277 = vmatpush.msrb.mxu1 %v1223_v3  ;;  %v1245_v3 = vperm.slane %v1242_v1, 1  ;;  %v1432_v1 = vld [vmem:[#allocation2 + $0x210] sm:$0xff] }
 0x963   : > { %1278 = vmatpush.msrb.mxu1 %v1221_v5 }
 0x965   : > { %1279 = vmatpush.msrb.mxu1 %v1219_v7 }
 0x967   : > { %1280 = vmatpush.msrb.mxu1 %v1217_v9 }
 0x969   : > { %1281 = vmatpush.msrb.mxu1 %v1215_v12 }
 0x96b   : > { %1282 = vmatpush.msrb.mxu1 %v1213_v15 }
 0x96d   : > { %1283 = vmatpush.msrb.mxu1 %v1211_v17 }
 0x9c7   : > { %v1183_v49 = vpop.xlane.xlu0 %1182 }
 0x9c8   : > { %v1184_v50 = vmul.f32 %v1183_v49, %v2773_v13  ;;  %v1330_v49 = vld [vmem:[#allocation7 + $0xc0] sm:$0xff] }
 0x9c9   : > { %1369 = vmatpush.msrb.mxu3 %v1330_v49  ;;  %v1451_v49 = vld [vmem:[#allocation2 + $0x2a8] sm:$0xff] }
 0x9ca   : > { %v2856_v51 = vsub.f32 %v1179_v45, %v1184_v50  ;;  %v1316_v45 = vld [vmem:[#allocation7 + $0x50] sm:$0xff]  ;;  %v1313_v50 = vld [vmem:[#allocation7 + $0x38] sm:$0xff] }
 0x9cb   : > { %1347 = vmatpush.msrb.mxu2 %v1316_v45 }
 0x9cc   : > { %v1186_v52 = vmul.f32 %v2856_v51, %v2856_v51 }
 0x9cd   : > { %1348 = vmatpush.msrb.mxu2 %v1315_v47  ;;  %v1454_v47 = vld [vmem:[#allocation2 + $0x2c0] sm:$0xff] }
 0x9ce   : > { %1187 = vadd.xlane.f32.xlu2 %v1186_v52  ;;  %v1312_v52 = vld [vmem:[#allocation7 + $0x30] sm:$0xff] }
 0x9cf   : > { %1349 = vmatpush.msrb.mxu2 %v1314_v37  ;;  %v1450_v37 = vld [vmem:[#allocation2 + $0x2a0] sm:$0xff] }
 0x9d1   : > { %1350 = vmatpush.msrb.mxu2 %v1313_v50  ;;  %v1452_v50 = vld [vmem:[#allocation2 + $0x2b0] sm:$0xff] }
 0x9d3   : > { %1351 = vmatpush.msrb.mxu2 %v1312_v52  ;;  %v1448_v52 = vld [vmem:[#allocation2 + $0x290] sm:$0xff] }
 0x9d5   : > { %1352 = vmatpush.msrb.mxu2 %v1311_v10  ;;  %v1444_v10 = vld [vmem:[#allocation2 + $0x270] sm:$0xff] }
 0x9d7   : > { %1353 = vmatpush.msrb.mxu2 %v1310_v55  ;;  %v1446_v55 = vld [vmem:[#allocation2 + $0x280] sm:$0xff] }
 0x9d9   : > { %1354 = vmatpush.msrb.mxu2 %v1309_v57  ;;  %v1442_v57 = vld [vmem:[#allocation2 + $0x260] sm:$0xff] }
 0x9db   : > { %1355 = vmatpush.msrb.mxu2 %v1308_v59  ;;  %v1438_v59 = vld [vmem:[#allocation2 + $0x240] sm:$0xff] }
 0x9dd   : > { %1356 = vmatpush.msrb.mxu2 %v1307_v61  ;;  %v1440_v61 = vld [vmem:[#allocation2 + $0x250] sm:$0xff] }
 0x9df   : > { %1357 = vmatpush.msrb.mxu2 %v1306_v63  ;;  %v1436_v63 = vld [vmem:[#allocation2 + $0x230] sm:$0xff] }
 0xa41   : > { %v1188_v25 = vpop.xlane.xlu2 %1187 }
 0xa42   : > { %v1189_v26 = vmul.f32 %v1188_v25, %v2773_v13 }
 0xa44   : > { %v1190_v29 = vadd.f32 1e-12, %v1189_v26 }
 0xa46   : > { %2409 = vrsqrt.f32 %v1190_v29  ;;  %vm1197_vm9 = vweird.f32 %v1190_v29 }
 0xa4c   : > { %v2410_v30 = vpop.eup %2409 }
 0xa4d   : > { %v1192_v31 = vmul.f32 %v2410_v30, %v1190_v29  ;;  %vm1198_vm8 = vweird.f32 %v2410_v30  ;;  %v2380_v29 = vld [vmem:[%s3109_s13] ss:$0 sm:$0xff] }
 0xa4e   : > { %vm1199_vm10 = vmor %vm1197_vm9, %vm1198_vm8 }
 0xa4f   : > { %v1193_v32 = vmul.f32 %v2410_v30, %v1192_v31 }
 0xa51   : > { %v1194_v33 = vmul.f32 0.5, %v1193_v32 }
 0xa53   : > { %v1195_v34 = vsub.f32 1.5, %v1194_v33 }
 0xa55   : > { %v1196_v35 = vmul.f32 %v2410_v30, %v1195_v34 }
 0xa57   : > { %v1200_v38 = vsel %vm1199_vm10, %v2410_v30, %v1196_v35  ;;  %v1459_v35 = vld [vmem:[#allocation2 + $0x2e8] sm:$0xff] }
 0xa58   : > { %v1201_v39 = vmul.f32 %v1200_v38, %v2856_v51  ;;  %v1329_v51 = vld [vmem:[#allocation7 + $0xb8] sm:$0xff]  ;;  %1471 = vmatpush.msra.mxu0 %v1459_v35 }
 0xa59   : > { %1370 = vmatpush.msrb.mxu3 %v1329_v51  ;;  %v1461_v38 = vld [vmem:[#allocation2 + $0x2f8] sm:$0xff]  ;;  %v1447_v51 = vld [vmem:[#allocation2 + $0x288] sm:$0xff] }
 0xa5a   : > { %v1205_v41 = vmul.f32 %v2378_v36, %v1201_v39  ;;  %v1460_v36 = vld [vmem:[#allocation2 + $0x2f0] sm:$0xff]  ;;  %1511 = vmatpush.msra.mxu2 %v1461_v38  ;;  %v2382_v38 = vld [vmem:[%s3111_s15] ss:$0 sm:$0xff] }
 0xa5b   : > { %1371 = vmatpush.msrb.mxu3 %v1328_v53  ;;  %1491 = vmatpush.msra.mxu1 %v1460_v36  ;;  %v1456_v39 = vld [vmem:[#allocation2 + $0x2d0] sm:$0xff]  ;;  %v1449_v53 = vld [vmem:[#allocation2 + $0x298] sm:$0xff] }
 0xa5c   : > { %v2868_v42 = vadd.f32 %v2379_v40, %v1205_v41  ;;  %v1457_v40 = vld [vmem:[#allocation2 + $0x2d8] sm:$0xff]  ;;  %v1458_v41 = vld [vmem:[#allocation2 + $0x2e0] sm:$0xff]  ;;  %1472 = vmatpush.msra.mxu0 %v1456_v39 }
 0xa5d   : > { %1372 = vmatpush.msrb.mxu3 %v1327_v54  ;;  %1492 = vmatpush.msra.mxu1 %v1457_v40  ;;  %v1445_v54 = vld [vmem:[#allocation2 + $0x278] sm:$0xff] }
 0xa5e   : > { %1264 = vmatmul.f32.vlgmr.msrb.gmra.mxu0 %v2868_v42  ;;  %1284 = vmatmul.f32.vlgmr.msrb.gmra.mxu1 %v2868_v42 }
 0xa5f   : > { %1373 = vmatpush.msrb.mxu3 %v1326_v56  ;;  %1512 = vmatpush.msra.mxu2 %v1458_v41  ;;  %v1441_v56 = vld [vmem:[#allocation2 + $0x258] sm:$0xff]  ;;  %v2293_v41 = vld [vmem:[%s3101_s5 + $0x3] sm:$0x7] }
 0xa60   : > { %1473 = vmatpush.msra.mxu0 %v1453_v46  ;;  %1493 = vmatpush.msra.mxu1 %v1454_v47 }
 0xa61   : > { %1374 = vmatpush.msrb.mxu3 %v1325_v58  ;;  %1513 = vmatpush.msra.mxu2 %v1455_v48  ;;  %v1443_v58 = vld [vmem:[#allocation2 + $0x268] sm:$0xff]  ;;  %v1467_v48 = vperm.slane %v2293_v41, 2 }
 0xa62   : > { %1474 = vmatpush.msra.mxu0 %v1450_v37  ;;  %1494 = vmatpush.msra.mxu1 %v1451_v49 }
 0xa63   : > { %1375 = vmatpush.msrb.mxu3 %v1324_v60  ;;  %1514 = vmatpush.msra.mxu2 %v1452_v50  ;;  %v1439_v60 = vld [vmem:[#allocation2 + $0x248] sm:$0xff] }
 0xa64   : > { %1475 = vmatpush.msra.mxu0 %v1447_v51  ;;  %1495 = vmatpush.msra.mxu1 %v1448_v52 }
 0xa65   : > { %1376 = vmatpush.msrb.mxu3 %v1323_v62  ;;  %1515 = vmatpush.msra.mxu2 %v1449_v53  ;;  %v1435_v62 = vld [vmem:[#allocation2 + $0x228] sm:$0xff] }
 0xa66   : > { %1476 = vmatpush.msra.mxu0 %v1444_v10  ;;  %1496 = vmatpush.msra.mxu1 %v1445_v54 }
 0xa67   : > { %1377 = vmatpush.msrb.mxu3 %v1322_v0  ;;  %1516 = vmatpush.msra.mxu2 %v1446_v55  ;;  %v1437_v0 = vld [vmem:[#allocation2 + $0x238] sm:$0xff] }
 0xa68   : > { %1477 = vmatpush.msra.mxu0 %v1441_v56  ;;  %1497 = vmatpush.msra.mxu1 %v1442_v57 }
 0xa69   : > { %1517 = vmatpush.msra.mxu2 %v1443_v58 }
 0xa6a   : > { %1478 = vmatpush.msra.mxu0 %v1438_v59  ;;  %1498 = vmatpush.msra.mxu1 %v1439_v60 }
 0xa6b   : > { %1518 = vmatpush.msra.mxu2 %v1440_v61 }
 0xa6c   : > { %1479 = vmatpush.msra.mxu0 %v1435_v62  ;;  %1499 = vmatpush.msra.mxu1 %v1436_v63 }
 0xa6d   : > { %1519 = vmatpush.msra.mxu2 %v1437_v0 }
 0xa6e   : > { %1480 = vmatpush.msra.mxu0 %v1432_v1 }
 0xadb   : > { %v1265_v4 = vpop.f32.mrf.mxu0  ;;  %v1285_v5 = vpop.f32.mrf.mxu1 }
 0xadc   : > { %v1266_v6 = vadd.f32 %v1265_v4, %v1244_v2  ;;  %v1286_v7 = vadd.f32 %v1285_v5, %v1245_v3  ;;  %v1433_v2 = vld [vmem:[#allocation2 + $0x218] sm:$0xff]  ;;  %v1434_v3 = vld [vmem:[#allocation2 + $0x220] sm:$0xff] }
 0xadd   : > { %1500 = vmatpush.msra.mxu1 %v1433_v2  ;;  %1520 = vmatpush.msra.mxu2 %v1434_v3  ;;  %v1429_v4 = vld [vmem:[#allocation2 + $0x1f8] sm:$0xff]  ;;  %v1430_v5 = vld [vmem:[#allocation2 + $0x200] sm:$0xff] }
 0xade   : > { %v1290_v8 = vmul.f32 0.044715, %v1266_v6  ;;  %v1291_v9 = vmul.f32 0.044715, %v1286_v7  ;;  %v1288_v22 = vmul.f32 0.5, %v1266_v6  ;;  %v1289_v25 = vmul.f32 0.5, %v1286_v7  ;;  %1481 = vmatpush.msra.mxu0 %v1429_v4 }
 0xadf   : > { %1501 = vmatpush.msra.mxu1 %v1430_v5 }
 0xae0   : > { %v1292_v11 = vmul.f32 %v1290_v8, %v1266_v6  ;;  %v1293_v12 = vmul.f32 %v1291_v9, %v1286_v7  ;;  %v1427_v8 = vld [vmem:[#allocation2 + $0x1e8] sm:$0xff]  ;;  %v1428_v9 = vld [vmem:[#allocation2 + $0x1f0] sm:$0xff] }
 0xae1   : > { %1502 = vmatpush.msra.mxu1 %v1427_v8 }
 0xae2   : > { %v1294_v14 = vmul.f32 %v1292_v11, %v1266_v6  ;;  %v1295_v15 = vmul.f32 %v1293_v12, %v1286_v7  ;;  %v1423_v11 = vld [vmem:[#allocation2 + $0x1c8] sm:$0xff]  ;;  %v1424_v12 = vld [vmem:[#allocation2 + $0x1d0] sm:$0xff] }
 0xae3   : > { %1503 = vmatpush.msra.mxu1 %v1424_v12 }
 0xae4   : > { %v1296_v16 = vadd.f32 %v1294_v14, %v1266_v6  ;;  %v1297_v17 = vadd.f32 %v1295_v15, %v1286_v7  ;;  %v1431_v6 = vld [vmem:[#allocation2 + $0x208] sm:$0xff]  ;;  %v1426_v7 = vld [vmem:[#allocation2 + $0x1e0] sm:$0xff]  ;;  %v1425_v14 = vld [vmem:[#allocation2 + $0x1d8] sm:$0xff] }
 0xae5   : > { %1521 = vmatpush.msra.mxu2 %v1431_v6  ;;  %1482 = vmatpush.msra.mxu0 %v1426_v7  ;;  %v1420_v15 = vld [vmem:[#allocation2 + $0x1b0] sm:$0xff] }
 0xae6   : > { %v1298_v18 = vmul.f32 0.7978846, %v1296_v16  ;;  %v1299_v19 = vmul.f32 0.7978846, %v1297_v17  ;;  %v1421_v16 = vld [vmem:[#allocation2 + $0x1b8] sm:$0xff]  ;;  %v1422_v17 = vld [vmem:[#allocation2 + $0x1c0] sm:$0xff] }
 0xae7   : > { %1522 = vmatpush.msra.mxu2 %v1428_v9  ;;  %1483 = vmatpush.msra.mxu0 %v1423_v11 }
 0xae8   : > { %2411 = vtanh.f32 %v1298_v18  ;;  %v1417_v18 = vld [vmem:[#allocation2 + $0x198] sm:$0xff]  ;;  %1504 = vmatpush.msra.mxu1 %v1421_v16 }
 0xae9   : > { %2413 = vtanh.f32 %v1299_v19  ;;  %1523 = vmatpush.msra.mxu2 %v1425_v14  ;;  %v1418_v19 = vld [vmem:[#allocation2 + $0x1a0] sm:$0xff]  ;;  %1484 = vmatpush.msra.mxu0 %v1420_v15 }
 0xaea   : > { %1505 = vmatpush.msra.mxu1 %v1418_v19 }
 0xaeb   : > { %1524 = vmatpush.msra.mxu2 %v1422_v17  ;;  %1485 = vmatpush.msra.mxu0 %v1417_v18 }
 0xaee   : > { %v2412_v20 = vpop.eup %2411 }
 0xaef   : > { %v2414_v21 = vpop.eup %2413  ;;  %v1302_v24 = vadd.f32 1.0, %v2412_v20  ;;  %v1419_v20 = vld [vmem:[#allocation2 + $0x1a8] sm:$0xff] }
 0xaf0   : > { %v1303_v26 = vadd.f32 1.0, %v2414_v21  ;;  %v1414_v21 = vld [vmem:[#allocation2 + $0x180] sm:$0xff]  ;;  %1525 = vmatpush.msra.mxu2 %v1419_v20 }
 0xaf1   : > { %v1304_v27 = vmul.f32 %v1302_v24, %v1288_v22  ;;  %v1415_v22 = vld [vmem:[#allocation2 + $0x188] sm:$0xff]  ;;  %v1416_v24 = vld [vmem:[#allocation2 + $0x190] sm:$0xff]  ;;  %1486 = vmatpush.msra.mxu0 %v1414_v21 }
 0xaf2   : > { %v1305_v28 = vmul.f32 %v1303_v26, %v1289_v25  ;;  %1506 = vmatpush.msra.mxu1 %v1415_v22  ;;  %1526 = vmatpush.msra.mxu2 %v1416_v24 }
 0xaf3   : > { %1358 = vmatmul.f32.vlgmr.msrb.gmra.mxu2 %v1304_v27 }
 0xaf4   : > { %1378 = vmatmul.f32.vlgmr.msrb.gmra.mxu3 %v1305_v28 }
 0xb76   : > { %v1359_v30 = vpop.f32.mrf.mxu2 }
 0xb77   : > { %v1360_v31 = vadd.f32 %v2380_v29, %v1359_v30  ;;  %v1379_v32 = vpop.f32.mrf.mxu3 }
 0xb79   : > { %v1380_v33 = vadd.f32 %v1379_v32, %v1360_v31 }
 0xb7b   : > { %v1382_v34 = vadd.f32 %v1380_v33, %v2868_v42 }
 0xb7d   : > { %1385 = vadd.xlane.f32.xlu1 %v1382_v34 }
 0xbf0   : > { %v1386_v43 = vpop.xlane.xlu1 %1385 }
 0xbf1   : > { %v1387_v44 = vmul.f32 %v1386_v43, %v2773_v13  ;;  %v1465_v43 = vperm.slane %v2293_v41, 0 }
 0xbf3   : > { %v2880_v45 = vsub.f32 %v1382_v34, %v1387_v44  ;;  %v2381_v34 = vld [vmem:[%s3110_s14] ss:$0 sm:$0xff]  ;;  %v1466_v44 = vperm.slane %v2293_v41, 1 }
 0xbf5   : > { %v1389_v42 = vmul.f32 %v2880_v45, %v2880_v45 }
 0xbf7   : > { %1390 = vadd.xlane.f32.xlu1 %v1389_v42 }
 0xc6a   : > { %v1391_v25 = vpop.xlane.xlu1 %1390 }
 0xc6b   : > { %v1392_v26 = vmul.f32 %v1391_v25, %v2773_v13 }
 0xc6d   : > { %v1393_v27 = vadd.f32 1e-12, %v1392_v26 }
 0xc6f   : > { %2415 = vrsqrt.f32 %v1393_v27  ;;  %vm1400_vm12 = vweird.f32 %v1393_v27 }
 0xc75   : > { %v2416_v28 = vpop.eup %2415 }
 0xc76   : > { %v1395_v29 = vmul.f32 %v2416_v28, %v1393_v27  ;;  %vm1401_vm11 = vweird.f32 %v2416_v28 }
 0xc77   : > { %vm1402_vm13 = vmor %vm1400_vm12, %vm1401_vm11 }
 0xc78   : > { %v1396_v30 = vmul.f32 %v2416_v28, %v1395_v29 }
 0xc7a   : > { %v1397_v31 = vmul.f32 0.5, %v1396_v30 }
 0xc7c   : > { %v1398_v32 = vsub.f32 1.5, %v1397_v31 }
 0xc7e   : > { %v1399_v33 = vmul.f32 %v2416_v28, %v1398_v32 }
 0xc80   : > { %v1403_v35 = vsel %vm1402_vm13, %v2416_v28, %v1399_v33 }
 0xc81   : > { %v1404_v36 = vmul.f32 %v1403_v35, %v2880_v45 }
 0xc83   : > { %v1408_v39 = vmul.f32 %v2381_v34, %v1404_v36 }
 0xc85   : > { %v2892_v40 = vadd.f32 %v2382_v38, %v1408_v39 }
 0xc87   : > { %1487 = vmatmul.f32.vlgmr.msra.gmra.mxu0 %v2892_v40  ;;  %1507 = vmatmul.f32.vlgmr.msra.gmra.mxu1 %v2892_v40 }
 0xc88   : > { %1527 = vmatmul.f32.vlgmr.msra.gmra.mxu2 %v2892_v40 }
 0xd04   : > { %v1488_v45 = vpop.f32.mrf.mxu0  ;;  %v1508_v42 = vpop.f32.mrf.mxu1 }
 0xd05   : > { %v1489_v46 = vadd.f32 %v1488_v45, %v1465_v43  ;;  %v1509_v47 = vadd.f32 %v1508_v42, %v1466_v44  ;;  %v1818_v43 = vld [vmem:[#allocation4 + $0xf8] sm:$0xff]  ;;  %v1817_v44 = vld [vmem:[#allocation4 + $0xf0] sm:$0xff]  ;;  %v1816_v45 = vld [vmem:[#allocation4 + $0xe8] sm:$0xff] }
 0xd06   : > { %v1815_v42 = vld [vmem:[#allocation4 + $0xe0] sm:$0xff] }
 0xd07   : > { %1659 = vrot.lane.b32.xlu2 %v1509_v47, %s2595_s19  ;;  %1593 = vrot.lane.b32.xlu1 %v1509_v47, %s2594_s6 }
 0xd08   : > { %2294 = vmatpush.xpose.msk.msra.mxu3 %vm864_vm4, %v1509_v47  ;;  %1591 = vrot.lane.b32.xlu0 %v1489_v46, %s2594_s6 }
 0xd0b   : > { %v1528_v37 = vpop.f32.mrf.mxu2  ;;  %2295 = vmatmul.msk.f32.vlgmr.msra.gmra.mxu3 %vm864_vm4, %v1489_v46 }
 0xd0c   : > { %v2905_v49 = vadd.f32 %v1528_v37, %v1467_v48  ;;  %v1812_v48 = vld [vmem:[#allocation4 + $0xc8] sm:$0xff]  ;;  %v1811_v37 = vld [vmem:[#allocation4 + $0xc0] sm:$0xff] }
 0xd0e   : > { %1586 = vmatpush.msrb.mxu0 %v2905_v49 }
 0xd0f   : > { %1724 = vrot.lane.b32.xlu1 %v1509_v47, %s2596_s20  ;;  %v1813_v47 = vld [vmem:[#allocation4 + $0xd0] sm:$0xff] }
 0xd10   : > { %1722 = vrot.lane.b32.xlu0 %v1489_v46, %s2596_s20 }
 0xd17   : > { %1657 = vrot.lane.b32.xlu1 %v1489_v46, %s2595_s19  ;;  %v1814_v46 = vld [vmem:[#allocation4 + $0xd8] sm:$0xff] }
 0xd61   : > { %v1660_v50 = vpop.permute.xlu2 %1659 }
 0xd62   : > { %2300 = vmatpush.xpose.msk.msrb.mxu3 %vm864_vm4, %v1660_v50 }
 0xd66   : > { %1824 = vmatpush.msra.mxu3 %v1818_v43  ;;  %v1881_v43 = vld [vmem:[#allocation6 + $0x118] sm:$0xff] }
 0xd68   : > { %1825 = vmatpush.msra.mxu3 %v1817_v44  ;;  %v1878_v44 = vld [vmem:[#allocation6 + $0x100] sm:$0xff] }
 0xd6a   : > { %1826 = vmatpush.msra.mxu3 %v1816_v45  ;;  %v1879_v45 = vld [vmem:[#allocation6 + $0x108] sm:$0xff] }
 0xd6c   : > { %1827 = vmatpush.msra.mxu3 %v1815_v42  ;;  %v1991_v42 = vld [vmem:[#allocation7 + $0x178] sm:$0xff] }
 0xd6e   : > { %1828 = vmatpush.msra.mxu3 %v1814_v46  ;;  %v2007_v46 = vld [vmem:[#allocation7 + $0x1f8] sm:$0xff] }
 0xd70   : > { %1829 = vmatpush.msra.mxu3 %v1813_v47  ;;  %v1990_v47 = vld [vmem:[#allocation7 + $0x170] sm:$0xff] }
 0xd72   : > { %1830 = vmatpush.msra.mxu3 %v1812_v48  ;;  %v2006_v48 = vld [vmem:[#allocation7 + $0x1f0] sm:$0xff] }
 0xd74   : > { %1831 = vmatpush.msra.mxu3 %v1811_v37  ;;  %v1989_v37 = vld [vmem:[#allocation7 + $0x168] sm:$0xff] }
 0xd79   : > { %v1594_v51 = vpop.permute.xlu1 %1593 }
 0xd7a   : > { %v1592_v52 = vpop.permute.xlu0 %1591  ;;  %2297 = vmatpush.xpose.msk.msrb.mxu1 %vm864_vm4, %v1594_v51 }
 0xd7d   : > { %2298 = vmatmul.msk.f32.vlgmr.msrb.gmra.mxu1 %vm864_vm4, %v1592_v52 }
 0xd81   : > { %v1725_v53 = vpop.permute.xlu1 %1724 }
 0xd82   : > { %2303 = vmatpush.xpose.msk.msra.mxu1 %vm864_vm4, %v1725_v53  ;;  %v1723_v10 = vpop.permute.xlu0 %1722 }
 0xd85   : > { %2304 = vmatmul.msk.f32.vlgmr.msra.gmra.mxu1 %vm864_vm4, %v1723_v10  ;;  %v1809_v10 = vld [vmem:[#allocation4 + $0xb0] sm:$0xff] }
 0xd89   : > { %v1658_v54 = vpop.permute.xlu1 %1657 }
 0xd8a   : > { %2301 = vmatmul.msk.f32.vlgmr.msrb.gmra.mxu3 %vm864_vm4, %v1658_v54  ;;  %v1808_v54 = vld [vmem:[#allocation4 + $0xa8] sm:$0xff] }
 0xd8e   : > { %v1554_v55 = vpop.f32.mrf.mxu3 }
 0xd8f   : > { %v1555_v56 = vadd.f32 %v2811_v23, %v1554_v55  ;;  %v1807_v55 = vld [vmem:[#allocation4 + $0xa0] sm:$0xff] }
 0xd91   : > { %v1557_v57 = vsel %vm891_vm5, %v1555_v56, -inf }
 0xd92   : > { %1558 = vmax.xlane.f32.xlu0 %v1557_v57  ;;  %v1805_v57 = vld [vmem:[#allocation4 + $0x90] sm:$0xff] }
 0xdfa   : > { %v1616_v58 = vpop.f32.mrf.mxu1 }
 0xdfb   : > { %v1617_v59 = vadd.f32 %v2811_v23, %v1616_v58  ;;  %v1804_v58 = vld [vmem:[#allocation4 + $0x88] sm:$0xff] }
 0xdfd   : > { %v1619_v60 = vsel %vm891_vm5, %v1617_v59, -inf }
 0xdfe   : > { %1620 = vmax.xlane.f32.xlu1 %v1619_v60 }
 0xe02   : > { %v1747_v61 = vpop.f32.mrf.mxu1 }
 0xe03   : > { %v1748_v62 = vadd.f32 %v2811_v23, %v1747_v61 }
 0xe05   : > { %v1559_v63 = vpop.xlane.xlu0 %1558  ;;  %v1750_v0 = vsel %vm891_vm5, %v1748_v62, -inf }
 0xe06   : > { %v1560_v1 = vsub.f32 %v1555_v56, %v1559_v63  ;;  %1751 = vmax.xlane.f32.xlu2 %v1750_v0  ;;  %v1806_v56 = vld [vmem:[#allocation4 + $0x98] sm:$0xff] }
 0xe08   : > { %v1561_v2 = vmul.f32 1.442695, %v1560_v1 }
 0xe0a   : > { %2417 = vpow2.f32 %v1561_v2  ;;  %v2383_v2 = vld [vmem:[%s3103_s7 + $0x1] ss:$0 sm:$0xff] }
 0xe0d   : > { %v1682_v3 = vpop.f32.mrf.mxu3 }
 0xe0e   : > { %v1683_v4 = vadd.f32 %v2811_v23, %v1682_v3 }
 0xe10   : > { %v2418_v5 = vpop.eup %2417  ;;  %v1685_v6 = vsel %vm891_vm5, %v1683_v4, -inf }
 0xe11   : > { %1686 = vmax.xlane.f32.xlu1 %v1685_v6  ;;  %v1563_v7 = vsel %vm891_vm5, %v2418_v5, 0.0  ;;  %v1908_v6 = vld [vmem:[#allocation6 + $0x1f0] sm:$0xff] }
 0xe12   : > { %1564 = vadd.xlane.f32.xlu2 %v1563_v7  ;;  %v1909_v7 = vld [vmem:[#allocation6 + $0x1f8] sm:$0xff] }
 0xe13   : > { %1937 = vmatpush.msrb.mxu1 %v1909_v7  ;;  %v2001_v7 = vld [vmem:[#allocation7 + $0x1c8] sm:$0xff] }
 0xe71   : > { %v1621_v8 = vpop.xlane.xlu1 %1620 }
 0xe72   : > { %v1622_v9 = vsub.f32 %v1617_v59, %v1621_v8  ;;  %v1803_v59 = vld [vmem:[#allocation4 + $0x80] sm:$0xff] }
 0xe73   : > { %v1906_v8 = vld [vmem:[#allocation6 + $0x1e0] sm:$0xff] }
 0xe74   : > { %v1623_v11 = vmul.f32 1.442695, %v1622_v9  ;;  %v1907_v9 = vld [vmem:[#allocation6 + $0x1e8] sm:$0xff] }
 0xe75   : > { %1938 = vmatpush.msrb.mxu1 %v1907_v9  ;;  %v2000_v9 = vld [vmem:[#allocation7 + $0x1c0] sm:$0xff] }
 0xe76   : > { %2419 = vpow2.f32 %v1623_v11 }
 0xe79   : > { %v1752_v12 = vpop.xlane.xlu2 %1751 }
 0xe7a   : > { %v1753_v14 = vsub.f32 %v1748_v62, %v1752_v12 }
 0xe7c   : > { %v2420_v15 = vpop.eup %2419  ;;  %v1754_v16 = vmul.f32 1.442695, %v1753_v14 }
 0xe7d   : > { %v1625_v17 = vsel %vm891_vm5, %v2420_v15, 0.0 }
 0xe7e   : > { %2421 = vpow2.f32 %v1754_v16  ;;  %1626 = vadd.xlane.f32.xlu0 %v1625_v17  ;;  %v1904_v16 = vld [vmem:[#allocation6 + $0x1d0] sm:$0xff]  ;;  %v1902_v17 = vld [vmem:[#allocation6 + $0x1c0] sm:$0xff] }
 0xe84   : > { %v2422_v23 = vpop.eup %2421  ;;  %v1687_v18 = vpop.xlane.xlu1 %1686 }
 0xe85   : > { %v1688_v19 = vsub.f32 %v1683_v4, %v1687_v18  ;;  %v1565_v20 = vpop.xlane.xlu2 %1564  ;;  %v1756_v21 = vsel %vm891_vm5, %v2422_v23, 0.0  ;;  %v1900_v18 = vld [vmem:[#allocation6 + $0x1b0] sm:$0xff] }
 0xe86   : > { %2423 = vrcp.f32 %v1565_v20  ;;  %1757 = vadd.xlane.f32.xlu1 %v1756_v21  ;;  %v1898_v20 = vld [vmem:[#allocation6 + $0x1a0] sm:$0xff]  ;;  %v1899_v21 = vld [vmem:[#allocation6 + $0x1a8] sm:$0xff] }
 0xe87   : > { %v1689_v22 = vmul.f32 1.442695, %v1688_v19  ;;  %v1901_v19 = vld [vmem:[#allocation6 + $0x1b8] sm:$0xff] }
 0xe89   : > { %2425 = vpow2.f32 %v1689_v22  ;;  %v1896_v22 = vld [vmem:[#allocation6 + $0x190] sm:$0xff] }
 0xe8c   : > { %v2424_v24 = vpop.eup %2423 }
 0xe8d   : > { %v1567_v25 = vmul.f32 %v2424_v24, %v2418_v5  ;;  %v1897_v24 = vld [vmem:[#allocation6 + $0x198] sm:$0xff] }
 0xe8f   : > { %v2426_v26 = vpop.eup %2425  ;;  %2296 = vmatmul.msk.f32.vlgmr.msrb.gmra.mxu0 %vm891_vm5, %v1567_v25  ;;  %v1894_v25 = vld [vmem:[#allocation6 + $0x180] sm:$0xff] }
 0xe90   : > { %v1691_v27 = vsel %vm891_vm5, %v2426_v26, 0.0 }
 0xe91   : > { %1692 = vadd.xlane.f32.xlu2 %v1691_v27  ;;  %v1892_v27 = vld [vmem:[#allocation6 + $0x170] sm:$0xff] }
 0xe92   : > { %1631 = vrot.lane.b32.xlu0 %v2905_v49, %s2594_s6 }
 0xe9f   : > { %1761 = vrot.lane.b32.xlu1 %v2905_v49, %s2596_s20 }
 0xea9   : > { %1696 = vrot.lane.b32.xlu2 %v2905_v49, %s2595_s19  ;;  %v1810_v49 = vld [vmem:[#allocation4 + $0xb8] sm:$0xff] }
 0xeaa   : > { %1832 = vmatpush.msra.mxu3 %v1810_v49  ;;  %v2005_v49 = vld [vmem:[#allocation7 + $0x1e8] sm:$0xff] }
 0xeac   : > { %1833 = vmatpush.msra.mxu3 %v1809_v10 }
 0xeae   : > { %1834 = vmatpush.msra.mxu3 %v1808_v54 }
 0xeb0   : > { %1835 = vmatpush.msra.mxu3 %v1807_v55 }
 0xeb2   : > { %1836 = vmatpush.msra.mxu3 %v1806_v56 }
 0xeb4   : > { %1837 = vmatpush.msra.mxu3 %v1805_v57 }
 0xeb6   : > { %1838 = vmatpush.msra.mxu3 %v1804_v58 }
 0xeb8   : > { %1839 = vmatpush.msra.mxu3 %v1803_v59 }
 0xeba   : > { %2033 = vmatpush.msrb.mxu3 %v2007_v46 }
 0xebc   : > { %2034 = vmatpush.msrb.mxu3 %v2006_v48 }
 0xebe   : > { %2035 = vmatpush.msrb.mxu3 %v2005_v49 }
 0xef1   : > { %v1627_v28 = vpop.xlane.xlu0 %1626 }
 0xef2   : > { %2427 = vrcp.f32 %v1627_v28  ;;  %v1893_v28 = vld [vmem:[#allocation6 + $0x178] sm:$0xff] }
 0xef8   : > { %v2428_v29 = vpop.eup %2427 }
 0xef9   : > { %v1629_v30 = vmul.f32 %v2428_v29, %v2420_v15  ;;  %v1758_v33 = vpop.xlane.xlu1 %1757  ;;  %v1890_v29 = vld [vmem:[#allocation6 + $0x160] sm:$0xff] }
 0xf04   : > { %v1693_v31 = vpop.xlane.xlu2 %1692  ;;  %v1632_v32 = vpop.permute.xlu0 %1631 }
 0xf05   : > { %2429 = vrcp.f32 %v1693_v31  ;;  %1652 = vmatpush.msrb.mxu2 %v1632_v32  ;;  %v1888_v31 = vld [vmem:[#allocation6 + $0x150] sm:$0xff]  ;;  %v1889_v32 = vld [vmem:[#allocation6 + $0x158] sm:$0xff] }
 0xf06   : > { %2299 = vmatmul.msk.f32.vlgmr.msrb.gmra.mxu2 %vm891_vm5, %v1629_v30  ;;  %2431 = vrcp.f32 %v1758_v33  ;;  %v1891_v30 = vld [vmem:[#allocation6 + $0x168] sm:$0xff]  ;;  %v1886_v33 = vld [vmem:[#allocation6 + $0x140] sm:$0xff] }
 0xf0b   : > { %v2430_v34 = vpop.eup %2429 }
 0xf0c   : > { %v1695_v35 = vmul.f32 %v2430_v34, %v2426_v26  ;;  %v1697_v36 = vpop.permute.xlu2 %1696  ;;  %v2432_v38 = vpop.eup %2431  ;;  %v1895_v26 = vld [vmem:[#allocation6 + $0x188] sm:$0xff] }
 0xf0d   : > { %1717 = vmatpush.msra.mxu0 %v1697_v36  ;;  %v1760_v39 = vmul.f32 %v2432_v38, %v2422_v23  ;;  %v1588_v50 = vpop.f32.mrf.mxu0  ;;  %v1903_v23 = vld [vmem:[#allocation6 + $0x1c8] sm:$0xff]  ;;  %v1885_v36 = vld [vmem:[#allocation6 + $0x138] sm:$0xff]  ;;  %v1882_v38 = vld [vmem:[#allocation6 + $0x120] sm:$0xff] }
 0xf0e   : > { %2302 = vmatmul.msk.f32.vlgmr.msra.gmra.mxu0 %vm891_vm5, %v1695_v35  ;;  %v1887_v34 = vld [vmem:[#allocation6 + $0x148] sm:$0xff]  ;;  %v1884_v35 = vld [vmem:[#allocation6 + $0x130] sm:$0xff] }
 0xf0f   : > { %1917 = vmatpush.msrb.mxu0 %v1908_v6  ;;  %v1985_v6 = vld [vmem:[#allocation7 + $0x148] sm:$0xff] }
 0xf11   : > { %v1762_v41 = vpop.permute.xlu1 %1761  ;;  %1918 = vmatpush.msrb.mxu0 %v1906_v8  ;;  %v1984_v8 = vld [vmem:[#allocation7 + $0x140] sm:$0xff] }
 0xf12   : > { %1782 = vmatpush.msra.mxu2 %v1762_v41  ;;  %v1880_v41 = vld [vmem:[#allocation6 + $0x110] sm:$0xff] }
 0xf13   : > { %2305 = vmatmul.msk.f32.vlgmr.msra.gmra.mxu2 %vm891_vm5, %v1760_v39  ;;  %1919 = vmatpush.msrb.mxu0 %v1904_v16  ;;  %v1883_v39 = vld [vmem:[#allocation6 + $0x128] sm:$0xff] }
 0xf14   : > { %2013 = vmatpush.msrb.mxu2 %v1991_v42  ;;  %v1981_v16 = vld [vmem:[#allocation7 + $0x128] sm:$0xff] }
 0xf15   : > { %1920 = vmatpush.msrb.mxu0 %v1902_v17  ;;  %v1980_v17 = vld [vmem:[#allocation7 + $0x120] sm:$0xff] }
 0xf16   : > { %2014 = vmatpush.msrb.mxu2 %v1990_v47 }
 0xf17   : > { %1921 = vmatpush.msrb.mxu0 %v1900_v18  ;;  %v1979_v18 = vld [vmem:[#allocation7 + $0x118] sm:$0xff] }
 0xf18   : > { %2015 = vmatpush.msrb.mxu2 %v1989_v37 }
 0xf19   : > { %1922 = vmatpush.msrb.mxu0 %v1898_v20  ;;  %v1978_v20 = vld [vmem:[#allocation7 + $0x110] sm:$0xff] }
 0xf1b   : > { %1923 = vmatpush.msrb.mxu0 %v1896_v22  ;;  %v1977_v22 = vld [vmem:[#allocation7 + $0x108] sm:$0xff] }
 0xf1d   : > { %1924 = vmatpush.msrb.mxu0 %v1894_v25  ;;  %v1976_v25 = vld [vmem:[#allocation7 + $0x100] sm:$0xff] }
 0xf1f   : > { %1925 = vmatpush.msrb.mxu0 %v1892_v27  ;;  %v2309_v27 = vld [vmem:[%s3107_s11 + $0x2] sm:$0x3] }
 0xf21   : > { %1926 = vmatpush.msrb.mxu0 %v1890_v29  ;;  %v1914_v29 = vperm.slane %v2309_v27, 1 }
 0xf23   : > { %1927 = vmatpush.msrb.mxu0 %v1888_v31 }
 0xf25   : > { %1928 = vmatpush.msrb.mxu0 %v1886_v33 }
 0xf27   : > { %1929 = vmatpush.msrb.mxu0 %v1884_v35 }
 0xf29   : > { %1930 = vmatpush.msrb.mxu0 %v1882_v38 }
 0xf2b   : > { %1931 = vmatpush.msrb.mxu0 %v1880_v41 }
 0xf2d   : > { %1932 = vmatpush.msrb.mxu0 %v1878_v44 }
 0xf89   : > { %v1654_v51 = vpop.f32.mrf.mxu2 }
 0xf8a   : > { %1788 = vrot.lane.b32.xlu0 %v1654_v51, %s2596_s20 }
 0xf8b   : > { %v1719_v52 = vpop.f32.mrf.mxu0 }
 0xf92   : > { %1792 = vrot.lane.b32.xlu0 %v1719_v52, %s2595_s19  ;;  %v1988_v52 = vld [vmem:[#allocation7 + $0x160] sm:$0xff]  ;;  %s3141_s19 = sld [smem:[#allocation21_spill]] }
 0xf93   : > { %2016 = vmatpush.msrb.mxu2 %v1988_v52 }
 0xf96   : > { %v1784_v53 = vpop.f32.mrf.mxu2 }
 0xf97   : > { %1796 = vrot.lane.b32.xlu1 %v1784_v53, %s2594_s6  ;;  %v2004_v53 = vld [vmem:[#allocation7 + $0x1e0] sm:$0xff] }
 0xf98   : > { %2036 = vmatpush.msrb.mxu3 %v2004_v53  ;;  %v2386_v53 = vld [vmem:[%s3109_s13 + $0x1] ss:$0 sm:$0xff] }
 0xffc   : > { %v1789_v60 = vpop.permute.xlu0 %1788 }
 0xffd   : > { %v1799_v62 = vsel %vm864_vm4, %v1588_v50, %v1789_v60  ;;  %v2384_v60 = vld [vmem:[%s3104_s8 + $0x1] ss:$0 sm:$0xff] }
0x1004   : > { %v1793_v61 = vpop.permute.xlu0 %1792 }
0x1005   : > { %v1800_v63 = vsel %vm1135_vm6, %v1799_v62, %v1793_v61 }
0x1009   : > { %v1797_v0 = vpop.permute.xlu1 %1796 }
0x100a   : > { %v1801_v1 = vsel %vm1137_vm7, %v1800_v63, %v1797_v0  ;;  %v2385_v63 = vld [vmem:[%s3105_s9 + $0x1] ss:$0 sm:$0xff] }
0x100b   : > { %1840 = vmatmul.f32.vlgmr.msra.gmra.mxu3 %v1801_v1 }
0x108e   : > { %v1841_v3 = vpop.f32.mrf.mxu3 }
0x108f   : > { %v1842_v4 = vadd.f32 %v2383_v2, %v1841_v3  ;;  %v1987_v2 = vld [vmem:[#allocation7 + $0x158] sm:$0xff] }
0x1090   : > { %v2003_v3 = vld [vmem:[#allocation7 + $0x1d8] sm:$0xff]  ;;  %2017 = vmatpush.msrb.mxu2 %v1987_v2 }
0x1091   : > { %v1844_v5 = vadd.f32 %v1842_v4, %v2892_v40  ;;  %v1905_v40 = vld [vmem:[#allocation6 + $0x1d8] sm:$0xff]  ;;  %2037 = vmatpush.msrb.mxu3 %v2003_v3  ;;  %v1986_v4 = vld [vmem:[#allocation7 + $0x150] sm:$0xff] }
0x1092   : > { %1939 = vmatpush.msrb.mxu1 %v1905_v40  ;;  %2018 = vmatpush.msrb.mxu2 %v1986_v4  ;;  %v1997_v40 = vld [vmem:[#allocation7 + $0x1a8] sm:$0xff]  ;;  %v2097_v2 = vld [vmem:[%s3112_s16 + $0x58] sm:$0xff]  ;;  %v2096_v3 = vld [vmem:[%s3112_s16 + $0x50] sm:$0xff] }
0x1093   : > { %1849 = vadd.xlane.f32.xlu2 %v1844_v5  ;;  %v2095_v4 = vld [vmem:[%s3112_s16 + $0x48] sm:$0xff] }
0x1094   : > { %1940 = vmatpush.msrb.mxu1 %v1903_v23  ;;  %2019 = vmatpush.msrb.mxu2 %v1985_v6  ;;  %v1996_v23 = vld [vmem:[#allocation7 + $0x1a0] sm:$0xff]  ;;  %v2093_v6 = vld [vmem:[%s3112_s16 + $0x38] sm:$0xff] }
0x1096   : > { %1941 = vmatpush.msrb.mxu1 %v1901_v19  ;;  %2020 = vmatpush.msrb.mxu2 %v1984_v8  ;;  %v1995_v19 = vld [vmem:[#allocation7 + $0x198] sm:$0xff]  ;;  %v2091_v8 = vld [vmem:[%s3112_s16 + $0x28] sm:$0xff] }
0x1098   : > { %1942 = vmatpush.msrb.mxu1 %v1899_v21  ;;  %v1994_v21 = vld [vmem:[#allocation7 + $0x190] sm:$0xff] }
0x109a   : > { %1943 = vmatpush.msrb.mxu1 %v1897_v24  ;;  %v1993_v24 = vld [vmem:[#allocation7 + $0x188] sm:$0xff] }
0x109c   : > { %1944 = vmatpush.msrb.mxu1 %v1895_v26  ;;  %v1992_v26 = vld [vmem:[#allocation7 + $0x180] sm:$0xff] }
0x109e   : > { %1945 = vmatpush.msrb.mxu1 %v1893_v28  ;;  %v1913_v28 = vperm.slane %v2309_v27, 0 }
0x10a0   : > { %1946 = vmatpush.msrb.mxu1 %v1891_v30 }
0x10a2   : > { %1947 = vmatpush.msrb.mxu1 %v1889_v32 }
0x10a4   : > { %1948 = vmatpush.msrb.mxu1 %v1887_v34 }
0x10a6   : > { %1949 = vmatpush.msrb.mxu1 %v1885_v36 }
0x10a8   : > { %1950 = vmatpush.msrb.mxu1 %v1883_v39 }
0x10aa   : > { %1951 = vmatpush.msrb.mxu1 %v1881_v43 }
0x10ac   : > { %1952 = vmatpush.msrb.mxu1 %v1879_v45 }
0x1106   : > { %v1850_v11 = vpop.xlane.xlu2 %1849 }
0x1107   : > { %v1851_v12 = vmul.f32 %v1850_v11, %v2773_v13  ;;  %v1983_v11 = vld [vmem:[#allocation7 + $0x138] sm:$0xff] }
0x1108   : > { %2021 = vmatpush.msrb.mxu2 %v1983_v11  ;;  %v2089_v11 = vld [vmem:[%s3112_s16 + $0x18] sm:$0xff] }
0x1109   : > { %v2950_v14 = vsub.f32 %v1844_v5, %v1851_v12  ;;  %v2002_v5 = vld [vmem:[#allocation7 + $0x1d0] sm:$0xff]  ;;  %v1999_v12 = vld [vmem:[#allocation7 + $0x1b8] sm:$0xff] }
0x110a   : > { %2038 = vmatpush.msrb.mxu3 %v2002_v5  ;;  %v2094_v5 = vld [vmem:[%s3112_s16 + $0x40] sm:$0xff] }
0x110b   : > { %v1853_v15 = vmul.f32 %v2950_v14, %v2950_v14 }
0x110c   : > { %2039 = vmatpush.msrb.mxu3 %v2001_v7  ;;  %v2092_v7 = vld [vmem:[%s3112_s16 + $0x30] sm:$0xff] }
0x110d   : > { %1854 = vadd.xlane.f32.xlu0 %v1853_v15  ;;  %v1998_v15 = vld [vmem:[#allocation7 + $0x1b0] sm:$0xff] }
0x110e   : > { %2040 = vmatpush.msrb.mxu3 %v2000_v9  ;;  %v2090_v9 = vld [vmem:[%s3112_s16 + $0x20] sm:$0xff] }
0x1110   : > { %2041 = vmatpush.msrb.mxu3 %v1999_v12  ;;  %v2088_v12 = vld [vmem:[%s3112_s16 + $0x10] sm:$0xff] }
0x1112   : > { %2042 = vmatpush.msrb.mxu3 %v1998_v15  ;;  %v2086_v15 = vld [vmem:[%s3112_s16] sm:$0xff] }
0x1114   : > { %2043 = vmatpush.msrb.mxu3 %v1997_v40  ;;  %v2138_v40 = vld [vmem:[%s3139_s4 + $0x70] sm:$0xff] }
0x1116   : > { %2044 = vmatpush.msrb.mxu3 %v1996_v23 }
0x1118   : > { %2045 = vmatpush.msrb.mxu3 %v1995_v19  ;;  %v2136_v19 = vld [vmem:[%s3139_s4 + $0x60] sm:$0xff] }
0x111a   : > { %2046 = vmatpush.msrb.mxu3 %v1994_v21  ;;  %v2135_v21 = vld [vmem:[%s3139_s4 + $0x58] sm:$0xff] }
0x111c   : > { %2047 = vmatpush.msrb.mxu3 %v1993_v24  ;;  %v2132_v24 = vld [vmem:[%s3139_s4 + $0x40] sm:$0xff] }
0x111e   : > { %2048 = vmatpush.msrb.mxu3 %v1992_v26  ;;  %v2131_v26 = vld [vmem:[%s3139_s4 + $0x38] sm:$0xff] }
0x1180   : > { %v1855_v50 = vpop.xlane.xlu0 %1854 }
0x1181   : > { %v1856_v51 = vmul.f32 %v1855_v50, %v2773_v13 }
0x1183   : > { %v1857_v10 = vadd.f32 1e-12, %v1856_v51 }
0x1185   : > { %2433 = vrsqrt.f32 %v1857_v10  ;;  %vm1864_vm15 = vweird.f32 %v1857_v10 }
0x118b   : > { %v2434_v54 = vpop.eup %2433 }
0x118c   : > { %v1859_v55 = vmul.f32 %v2434_v54, %v1857_v10  ;;  %vm1865_vm14 = vweird.f32 %v2434_v54 }
0x118d   : > { %vm1866_vm0 = vmor %vm1864_vm15, %vm1865_vm14 }
0x118e   : > { %v1860_v56 = vmul.f32 %v2434_v54, %v1859_v55 }
0x1190   : > { %v1861_v57 = vmul.f32 0.5, %v1860_v56 }
0x1192   : > { %v1862_v58 = vsub.f32 1.5, %v1861_v57 }
0x1194   : > { %v1863_v59 = vmul.f32 %v2434_v54, %v1862_v58  ;;  %v2101_v58 = vld [vmem:[%s3112_s16 + $0x78] sm:$0xff] }
0x1195   : > { %2103 = vmatpush.msra.mxu0 %v2101_v58 }
0x1196   : > { %v1867_v61 = vsel %vm1866_vm0, %v2434_v54, %v1863_v59  ;;  %v2100_v59 = vld [vmem:[%s3112_s16 + $0x70] sm:$0xff] }
0x1197   : > { %v1868_v62 = vmul.f32 %v1867_v61, %v2950_v14  ;;  %v1982_v14 = vld [vmem:[#allocation7 + $0x130] sm:$0xff]  ;;  %2104 = vmatpush.msra.mxu0 %v2100_v59 }
0x1198   : > { %2022 = vmatpush.msrb.mxu2 %v1982_v14  ;;  %v2087_v14 = vld [vmem:[%s3112_s16 + $0x8] sm:$0xff] }
0x1199   : > { %v1872_v0 = vmul.f32 %v2384_v60, %v1868_v62 }
0x119a   : > { %2023 = vmatpush.msrb.mxu2 %v1981_v16  ;;  %v2139_v16 = vld [vmem:[%s3139_s4 + $0x78] sm:$0xff] }
0x119b   : > { %v2962_v1 = vadd.f32 %v2385_v63, %v1872_v0  ;;  %v2099_v0 = vld [vmem:[%s3112_s16 + $0x68] sm:$0xff]  ;;  %2141 = vmatpush.msra.mxu1 %v2139_v16 }
0x119c   : > { %2024 = vmatpush.msrb.mxu2 %v1980_v17  ;;  %2105 = vmatpush.msra.mxu0 %v2099_v0  ;;  %v2137_v17 = vld [vmem:[%s3139_s4 + $0x68] sm:$0xff] }
0x119d   : > { %1933 = vmatmul.f32.vlgmr.msrb.gmra.mxu0 %v2962_v1  ;;  %1953 = vmatmul.f32.vlgmr.msrb.gmra.mxu1 %v2962_v1 }
0x119e   : > { %2025 = vmatpush.msrb.mxu2 %v1979_v18  ;;  %2142 = vmatpush.msra.mxu1 %v2138_v40 }
0x11a0   : > { %2026 = vmatpush.msrb.mxu2 %v1978_v20  ;;  %2143 = vmatpush.msra.mxu1 %v2137_v17 }
0x11a2   : > { %2027 = vmatpush.msrb.mxu2 %v1977_v22  ;;  %2144 = vmatpush.msra.mxu1 %v2136_v19  ;;  %v2134_v22 = vld [vmem:[%s3139_s4 + $0x50] sm:$0xff] }
0x11a4   : > { %2028 = vmatpush.msrb.mxu2 %v1976_v25  ;;  %2145 = vmatpush.msra.mxu1 %v2135_v21 }
0x11a6   : > { %2146 = vmatpush.msra.mxu1 %v2134_v22 }
0x121a   : > { %v1934_v30 = vpop.f32.mrf.mxu0  ;;  %v1954_v31 = vpop.f32.mrf.mxu1 }
0x121b   : > { %v1935_v32 = vadd.f32 %v1934_v30, %v1913_v28  ;;  %v1955_v33 = vadd.f32 %v1954_v31, %v1914_v29  ;;  %v2130_v28 = vld [vmem:[%s3139_s4 + $0x30] sm:$0xff]  ;;  %v2129_v30 = vld [vmem:[%s3139_s4 + $0x28] sm:$0xff] }
0x121d   : > { %v1959_v34 = vmul.f32 0.044715, %v1935_v32  ;;  %v1960_v35 = vmul.f32 0.044715, %v1955_v33  ;;  %v1957_v48 = vmul.f32 0.5, %v1935_v32  ;;  %v1958_v49 = vmul.f32 0.5, %v1955_v33 }
0x121f   : > { %v1961_v36 = vmul.f32 %v1959_v34, %v1935_v32  ;;  %v1962_v38 = vmul.f32 %v1960_v35, %v1955_v33  ;;  %v2387_v34 = vld [vmem:[%s3110_s14 + $0x1] ss:$0 sm:$0xff] }
0x1221   : > { %v1963_v39 = vmul.f32 %v1961_v36, %v1935_v32  ;;  %v1964_v41 = vmul.f32 %v1962_v38, %v1955_v33  ;;  %v2388_v38 = vld [vmem:[%s3111_s15 + $0x1] ss:$0 sm:$0xff] }
0x1223   : > { %v1965_v43 = vadd.f32 %v1963_v39, %v1935_v32  ;;  %v1966_v44 = vadd.f32 %v1964_v41, %v1955_v33 }
0x1225   : > { %v1967_v45 = vmul.f32 0.7978846, %v1965_v43  ;;  %v1968_v42 = vmul.f32 0.7978846, %v1966_v44  ;;  %v2128_v43 = vld [vmem:[%s3139_s4 + $0x20] sm:$0xff]  ;;  %v2127_v44 = vld [vmem:[%s3139_s4 + $0x18] sm:$0xff] }
0x1227   : > { %2435 = vtanh.f32 %v1967_v45  ;;  %v2126_v45 = vld [vmem:[%s3139_s4 + $0x10] sm:$0xff] }
0x1228   : > { %2437 = vtanh.f32 %v1968_v42  ;;  %v2125_v42 = vld [vmem:[%s3139_s4 + $0x8] sm:$0xff] }
0x122d   : > { %v2436_v46 = vpop.eup %2435 }
0x122e   : > { %v2438_v47 = vpop.eup %2437  ;;  %v1971_v37 = vadd.f32 1.0, %v2436_v46  ;;  %v2124_v46 = vld [vmem:[%s3139_s4] sm:$0xff] }
0x122f   : > { %v1972_v50 = vadd.f32 1.0, %v2438_v47  ;;  %v2102_v47 = vld [vmem:[%s3140_s1] sm:$0x1] }
0x1230   : > { %v1973_v51 = vmul.f32 %v1971_v37, %v1957_v48 }
0x1231   : > { %v1974_v52 = vmul.f32 %v1972_v50, %v1958_v49  ;;  %v2140_v50 = vld [vmem:[%s3141_s19] sm:$0x1] }
0x1232   : > { %2029 = vmatmul.f32.vlgmr.msrb.gmra.mxu2 %v1973_v51 }
0x1233   : > { %2049 = vmatmul.f32.vlgmr.msrb.gmra.mxu3 %v1974_v52 }
0x12b5   : > { %v2030_v10 = vpop.f32.mrf.mxu2 }
0x12b6   : > { %v2031_v54 = vadd.f32 %v2386_v53, %v2030_v10  ;;  %v2050_v55 = vpop.f32.mrf.mxu3 }
0x12b8   : > { %v2051_v56 = vadd.f32 %v2050_v55, %v2031_v54 }
0x12ba   : > { %v2053_v57 = vadd.f32 %v2051_v56, %v2962_v1  ;;  %v2098_v1 = vld [vmem:[%s3112_s16 + $0x60] sm:$0xff] }
0x12bb   : > { %2106 = vmatpush.msra.mxu0 %v2098_v1 }
0x12bc   : > { %2058 = vadd.xlane.f32.xlu1 %v2053_v57 }
0x12bd   : > { %2107 = vmatpush.msra.mxu0 %v2097_v2 }
0x12bf   : > { %2108 = vmatpush.msra.mxu0 %v2096_v3 }
0x12c1   : > { %2109 = vmatpush.msra.mxu0 %v2095_v4 }
0x12c3   : > { %2110 = vmatpush.msra.mxu0 %v2094_v5 }
0x12c5   : > { %2111 = vmatpush.msra.mxu0 %v2093_v6 }
0x12c7   : > { %2112 = vmatpush.msra.mxu0 %v2092_v7 }
0x12c9   : > { %2113 = vmatpush.msra.mxu0 %v2091_v8 }
0x12cb   : > { %2114 = vmatpush.msra.mxu0 %v2090_v9 }
0x12cd   : > { %2115 = vmatpush.msra.mxu0 %v2089_v11 }
0x12cf   : > { %2116 = vmatpush.msra.mxu0 %v2088_v12 }
0x12d1   : > { %2117 = vmatpush.msra.mxu0 %v2087_v14 }
0x12d3   : > { %2118 = vmatpush.msra.mxu0 %v2086_v15 }
0x132f   : > { %v2059_v60 = vpop.xlane.xlu1 %2058 }
0x1330   : > { %v2060_v61 = vmul.f32 %v2059_v60, %v2773_v13 }
0x1332   : > { %v2980_v62 = vsub.f32 %v2053_v57, %v2060_v61 }
0x1334   : > { %v2062_v63 = vmul.f32 %v2980_v62, %v2980_v62 }
0x1336   : > { %2063 = vadd.xlane.f32.xlu2 %v2062_v63 }
0x13a9   : > { %v2064_v23 = vpop.xlane.xlu2 %2063 }
0x13aa   : > { %v2065_v18 = vmul.f32 %v2064_v23, %v2773_v13  ;;  %v2133_v13 = vld [vmem:[%s3139_s4 + $0x48] sm:$0xff] }
0x13ab   : > { %2147 = vmatpush.msra.mxu1 %v2133_v13 }
0x13ac   : > { %v2066_v20 = vadd.f32 1e-12, %v2065_v18 }
0x13ad   : > { %2148 = vmatpush.msra.mxu1 %v2132_v24 }
0x13ae   : > { %2439 = vrsqrt.f32 %v2066_v20  ;;  %vm2073_vm2 = vweird.f32 %v2066_v20 }
0x13af   : > { %2149 = vmatpush.msra.mxu1 %v2131_v26 }
0x13b1   : > { %2150 = vmatpush.msra.mxu1 %v2130_v28 }
0x13b3   : > { %2151 = vmatpush.msra.mxu1 %v2129_v30 }
0x13b4   : > { %v2440_v25 = vpop.eup %2439 }
0x13b5   : > { %v2068_v27 = vmul.f32 %v2440_v25, %v2066_v20  ;;  %vm2074_vm1 = vweird.f32 %v2440_v25  ;;  %2152 = vmatpush.msra.mxu1 %v2128_v43 }
0x13b6   : > { %vm2075_vm3 = vmor %vm2073_vm2, %vm2074_vm1 }
0x13b7   : > { %v2069_v29 = vmul.f32 %v2440_v25, %v2068_v27  ;;  %2153 = vmatpush.msra.mxu1 %v2127_v44 }
0x13b9   : > { %v2070_v31 = vmul.f32 0.5, %v2069_v29  ;;  %2154 = vmatpush.msra.mxu1 %v2126_v45 }
0x13bb   : > { %v2071_v32 = vsub.f32 1.5, %v2070_v31  ;;  %2155 = vmatpush.msra.mxu1 %v2125_v42 }
0x13bd   : > { %v2072_v33 = vmul.f32 %v2440_v25, %v2071_v32  ;;  %2156 = vmatpush.msra.mxu1 %v2124_v46 }
0x13bf   : > { %v2076_v35 = vsel %vm2075_vm3, %v2440_v25, %v2072_v33 }
0x13c0   : > { %v2077_v36 = vmul.f32 %v2076_v35, %v2980_v62 }
0x13c2   : > { %v2081_v39 = vmul.f32 %v2387_v34, %v2077_v36 }
0x13c4   : > { %v2085_v41 = vadd.f32 %v2388_v38, %v2081_v39 }
0x13c6   : > { %2119 = vmatmul.f32.vlgmr.msra.gmra.mxu0 %v2085_v41 }
0x1443   : > { %v2120_v48 = vpop.f32.mrf.mxu0 }
0x1444   : > { %v2121_v37 = vadd.f32 %v2120_v48, %v2102_v47 }
0x1446   : > { %2441 = vtanh.f32 %v2121_v37 }
0x144c   : > { %v2442_v49 = vpop.eup %2441 }
0x144d   : > { %2157 = vmatmul.f32.vlgmr.msra.gmra.mxu1 %v2442_v49 }
0x14ca   : > { %v2158_v51 = vpop.f32.mrf.mxu1 }
0x14cb   : > { %v2159_v52 = vadd.f32 %v2158_v51, %v2140_v50 }
0x14cd   : > { %v2161_v53 = vperm.slane %v2159_v52, 0 }
0x14cf   : > { %2162 = vst [vmem:[%s705_s22] sm:$0xff] %v2161_v53 }
0x14d0 PF: > { %s3143_s23 = sld [smem:[#allocation12_spill]] }
0x14d6   : > { %s33_s1 = sadd.s32 1, %s3143_s23  }
0x14d7   : > { %p30_p7 = scmp.ge.s32.totalorder %s33_s1, 4  }
0x14d9   :  { %32 = sbr.rel (!%p30_p7) target bundleno = 14 (0xe), region = 162 }
0x14de   :  { %2182 = vsyncpa [#allocation3], 1 }
0x14df   :  { %2184 = vsyncpa [#allocation3 + $0x1], 1 }
0x14e0   :  { %2185 = vsyncpa [#allocation5], 1 }
0x14e1   :  { %2186 = vsyncpa [#allocation8], 1 }

</bundles_post_ra>
